<compile_context>
chip_gen: v7x
topology: tpu7x:2x2x1
jax: 0.10.0
libtpu: 0.0.40
codegen_flags: <defaults>
</compile_context>

<pallas_src>
import numpy as np
import jax
import jax.numpy as jnp
from jax import lax
from jax.experimental import pallas as pl
from jax.experimental.pallas import tpu as pltpu

LN_EPS = 1e-5
HIDDEN = 64   # per-branch hidden width, fixed by the module definition
OUT_W = 128   # lane-dense packed widths: [shared|specific|disc_pre/domain|pad]


def _round_up(x, m):
    return (x + m - 1) // m * m


# ----------------------------------------------------------------------------
# Kernel
# ----------------------------------------------------------------------------
def _dme_kernel(x_ref, w1_ref, b1_ref, s_ref, g_ref, bt_ref,
                w2_ref, b2_ref, wd2_ref, bd2_ref, out_ref):
    """One batch tile: fused shared+specific encoders + discriminator.

    Lane layouts (width 128):
      h / hn : [shared_hidden(64) | specific_hidden(64)]
      fused  : [shared(sd) | specific(pd) | disc_pre(dh) | 0]
      out    : [shared(sd) | specific(pd) | domain(nd)   | 0]
    """
    mm_dt = w1_ref.dtype                                  # MXU operand dtype
    enc_w = out_ref.shape[1] - wd2_ref.shape[1]           # static: sd + pd

    x = x_ref[...]
    if x.dtype != mm_dt:                                  # trace-time check
        x = x.astype(mm_dt)

    # Fused first layers: (TB, in) @ (in, 128) -> [shared_pre | specific_pre].
    h = jnp.dot(x, w1_ref[...], preferred_element_type=jnp.float32) + b1_ref[...]

    # Per-half LayerNorm stats via a block-diagonal averaging matrix: keeps
    # full 128-lane vregs, reductions run on the (otherwise idle) MXU. f32.
    s = s_ref[...]
    mu = jnp.dot(h, s, preferred_element_type=jnp.float32)
    msq = jnp.dot(h * h, s, preferred_element_type=jnp.float32)
    var = jnp.maximum(msq - mu * mu, 0.0)                 # one-pass guard
    hn = (h - mu) * lax.rsqrt(var + LN_EPS) * g_ref[...] + bt_ref[...]
    hn = jnp.maximum(hn, 0.0).astype(mm_dt)               # ReLU; Dropout=identity

    # Fused second layers + folded first discriminator layer:
    # (TB,128)@(128,128) -> [shared | specific | disc_pre | pad].
    fused = jnp.dot(hn, w2_ref[...], preferred_element_type=jnp.float32) + b2_ref[...]

    # Encoder outputs straight into the packed output tile (no lane concat).
    out_ref[:, :enc_w] = fused[:, :enc_w].astype(out_ref.dtype)

    # Discriminator second layer on the ReLU'd pre-activation lanes.
    d = jnp.maximum(fused[:, enc_w:], 0.0).astype(mm_dt)
    dom = jnp.dot(d, wd2_ref[...], preferred_element_type=jnp.float32) + bd2_ref[...]
    out_ref[:, enc_w:] = dom.astype(out_ref.dtype)


# ----------------------------------------------------------------------------
# Parameters
# ----------------------------------------------------------------------------
def init_params(key, input_dim, shared_dim=32, specific_dim=32,
                hidden=HIDDEN, disc_hidden=32, n_domains=3):
    """Deterministic parameter init (Kaiming-uniform-ish like torch Linear)."""
    def linear(k, fan_in, fan_out):
        k1, k2 = jax.random.split(k)
        bound = 1.0 / jnp.sqrt(fan_in)
        w = jax.random.uniform(k1, (fan_in, fan_out), jnp.float32, -bound, bound)
        b = jax.random.uniform(k2, (1, fan_out), jnp.float32, -bound, bound)
        return w, b

    ks = jax.random.split(key, 6)
    ws1, bs1 = linear(ks[0], input_dim, hidden)
    ws2, bs2 = linear(ks[1], hidden, shared_dim)
    wp1, bp1 = linear(ks[2], input_dim, hidden)
    wp2, bp2 = linear(ks[3], hidden, specific_dim)
    wd1, bd1 = linear(ks[4], shared_dim, disc_hidden)
    wd2, bd2 = linear(ks[5], disc_hidden, n_domains)
    gs = jnp.ones((1, hidden), jnp.float32)   # LayerNorm defaults: weight=1, bias=0
    bts = jnp.zeros((1, hidden), jnp.float32)
    gp = jnp.ones((1, hidden), jnp.float32)
    btp = jnp.zeros((1, hidden), jnp.float32)
    return dict(
        ws1=ws1, bs1=bs1, gs=gs, bts=bts, ws2=ws2, bs2=bs2,
        wp1=wp1, bp1=bp1, gp=gp, btp=btp, wp2=wp2, bp2=bp2,
        wd1=wd1, bd1=bd1, wd2=wd2, bd2=bd2,
    )


def fuse_params(p, shared_dim=32, specific_dim=32, disc_hidden=32, n_domains=3,
                matmul_dtype=jnp.float32):
    """Pre-fuse the per-branch weights once (not per forward call)."""
    hidden = p["ws1"].shape[1]
    enc_w = shared_dim + specific_dim
    hi = lax.Precision.HIGHEST            # exact f32 weight folds

    # Fused first layers.
    w1 = jnp.concatenate([p["ws1"], p["wp1"]], axis=1)          # (in, 2*hidden)
    b1 = jnp.concatenate([p["bs1"], p["bp1"]], axis=1)
    g = jnp.concatenate([p["gs"], p["gp"]], axis=1)
    bt = jnp.concatenate([p["bts"], p["btp"]], axis=1)

    # Block-diagonal per-half averaging matrix for LayerNorm stats (f32 always).
    blk = jnp.full((hidden, hidden), 1.0 / hidden, jnp.float32)
    zero = jnp.zeros((hidden, hidden), jnp.float32)
    s = jnp.block([[blk, zero], [zero, blk]])                   # (128, 128)

    # Fused second layers (block-diagonal) + folded first discriminator layer:
    # disc_pre = shared @ wd1 + bd1 = hn_s @ (ws2 @ wd1) + (bs2 @ wd1 + bd1).
    w2 = jnp.zeros((2 * hidden, OUT_W), jnp.float32)
    w2 = w2.at[:hidden, :shared_dim].set(p["ws2"])
    w2 = w2.at[hidden:, shared_dim:enc_w].set(p["wp2"])
    w2 = w2.at[:hidden, enc_w:enc_w + disc_hidden].set(
        jnp.matmul(p["ws2"], p["wd1"], precision=hi))
    b2 = jnp.zeros((1, OUT_W), jnp.float32)
    b2 = b2.at[:, :shared_dim].set(p["bs2"])
    b2 = b2.at[:, shared_dim:enc_w].set(p["bp2"])
    b2 = b2.at[:, enc_w:enc_w + disc_hidden].set(
        jnp.matmul(p["bs2"], p["wd1"], precision=hi) + p["bd1"])

    # Second discriminator layer, zero-padded so the packed output is 128 lanes.
    wd2 = jnp.zeros((OUT_W - enc_w, OUT_W - enc_w), jnp.float32)
    wd2 = wd2.at[:disc_hidden, :n_domains].set(p["wd2"])
    bd2 = jnp.zeros((1, OUT_W - enc_w), jnp.float32)
    bd2 = bd2.at[:, :n_domains].set(p["bd2"])

    cast = lambda w: w.astype(matmul_dtype)   # MXU operands only; stats/biases stay f32
    return dict(
        w1=cast(w1), b1=b1, s=s, g=g, bt=bt,
        w2=cast(w2), b2=b2, wd2=cast(wd2), bd2=bd2,
        shared_dim=shared_dim, specific_dim=specific_dim, n_domains=n_domains,
    )


# ----------------------------------------------------------------------------
# Wrapper
# ----------------------------------------------------------------------------
def disentangled_modality_encoder(x, fused, modality_idx=None, block_b=None,
                                  out_dtype=jnp.float32):
    """Forward pass. Returns (shared, specific, domain_pred).

    modality_idx is unused by the reference forward; kept for signature parity.
    """
    del modality_idx
    B, input_dim = x.shape
    sd = fused["shared_dim"]
    pd = fused["specific_dim"]
    nd = fused["n_domains"]
    enc_w = sd + pd

    weight_args = (fused["w1"], fused["b1"], fused["s"], fused["g"], fused["bt"],
                   fused["w2"], fused["b2"], fused["wd2"], fused["bd2"])

    x_bytes = x.dtype.itemsize
    out_bytes = np.dtype(out_dtype).itemsize
    # Per-row VMEM cost: double-buffered streamed x/out tiles plus ~6 live
    # (TB, 128) f32 intermediates (h, mu, msq, hn, fused, dom) at large TB.
    per_row = 2 * (input_dim * x_bytes + OUT_W * out_bytes) + 6 * OUT_W * 4

    if block_b is None:
        budget = 20 << 20                       # ~20 MiB for streamed + live data
        tb = max(8, min(8192, budget // per_row))
    else:
        tb = max(8, block_b)
    # >= 2 grid steps when B allows (v7x megacore), never larger than the
    # 8-rounded batch, always a sublane multiple of 8.
    if B > 8:
        tb = min(tb, _round_up((B + 1) // 2, 8))
    tb = min(tb, _round_up(B, 8))
    tb = _round_up(tb, 8)
    steps = pl.cdiv(B, tb)     # ragged last block: OOB reads unspecified (rows
                               # are independent), OOB writes dropped.

    weight_bytes = sum(int(a.size) * a.dtype.itemsize for a in weight_args)
    vmem_limit = int(min(max(per_row * tb + 2 * weight_bytes + (2 << 20), 32 << 20),
                         64 << 20))

    def const_spec(a):
        # Full-array block, constant index_map -> DMA'd once, VMEM-resident.
        return pl.BlockSpec(a.shape, lambda i: (0,) * a.ndim)

    packed = pl.pallas_call(
        _dme_kernel,
        out_shape=jax.ShapeDtypeStruct((B, OUT_W), out_dtype),
        grid=(steps,),
        in_specs=[pl.BlockSpec((tb, input_dim), lambda i: (i, 0))]
                 + [const_spec(a) for a in weight_args],
        out_specs=pl.BlockSpec((tb, OUT_W), lambda i: (i, 0)),
        compiler_params=pltpu.CompilerParams(
            dimension_semantics=("parallel",),
            vmem_limit_bytes=vmem_limit),
    )(x, *weight_args)

    shared = packed[:, :sd]
    specific = packed[:, sd:enc_w]
    domain = packed[:, enc_w:enc_w + nd]
    return shared, specific, domain


# ----------------------------------------------------------------------------
# Pure-JAX reference (mirrors the PyTorch forward in eval mode)
# ----------------------------------------------------------------------------
def _reference(x, p):
    def branch(w1, b1, g, b, w2, b2):
        h = x @ w1 + b1
        mu = h.mean(-1, keepdims=True)
        var = ((h - mu) ** 2).mean(-1, keepdims=True)
        h = (h - mu) / jnp.sqrt(var + LN_EPS) * g + b
        h = jnp.maximum(h, 0.0)
        return h @ w2 + b2

    shared = branch(p["ws1"], p["bs1"], p["gs"], p["bts"], p["ws2"], p["bs2"])
    specific = branch(p["wp1"], p["bp1"], p["gp"], p["btp"], p["wp2"], p["bp2"])
    d = jnp.maximum(shared @ p["wd1"] + p["bd1"], 0.0)
    domain = d @ p["wd2"] + p["bd2"]
    return shared, specific, domain


if __name__ == "__main__":
    key = jax.random.PRNGKey(0)
    k_x, k_p = jax.random.split(key)

    # B deliberately not a multiple of 8 nor of the tile -> exercises the
    # un-padded ragged last block; auto tiling gives a 2-step parallel grid.
    B, input_dim = 200, 48
    x = jax.random.normal(k_x, (B, input_dim), jnp.float32)
    params = init_params(k_p, input_dim, shared_dim=32, specific_dim=32)
    modality_idx = 0  # unused, mirrors the PyTorch signature

    rs, rp, rd = _reference(x, params)

    # --- f32 MXU-operand path, auto tile (>=2 grid steps, ragged last block) --
    fused_f32 = fuse_params(params)
    shared, specific, domain_pred = disentangled_modality_encoder(
        x, fused_f32, modality_idx)
    jax.block_until_ready((shared, specific, domain_pred))
    assert shared.shape == (B, 32)
    assert specific.shape == (B, 32)
    assert domain_pred.shape == (B, 3)
    assert jnp.allclose(shared, rs, atol=1e-3, rtol=1e-3)
    assert jnp.allclose(specific, rp, atol=1e-3, rtol=1e-3)
    assert jnp.allclose(domain_pred, rd, atol=1e-3, rtol=1e-3)

    # --- small explicit tile: more grid steps, exercises the pipeline ---------
    s2, p2, d2 = disentangled_modality_encoder(x, fused_f32, modality_idx,
                                               block_b=64)
    jax.block_until_ready((s2, p2, d2))
    assert jnp.allclose(s2, rs, atol=1e-3, rtol=1e-3)
    assert jnp.allclose(p2, rp, atol=1e-3, rtol=1e-3)
    assert jnp.allclose(d2, rd, atol=1e-3, rtol=1e-3)

    # --- bf16 MXU operands + bf16 packed output (v6e/v7x fast path): loose ----
    fused_bf16 = fuse_params(params, matmul_dtype=jnp.bfloat16)
    s16, p16, d16 = disentangled_modality_encoder(
        x, fused_bf16, modality_idx, out_dtype=jnp.bfloat16)
    jax.block_until_ready((s16, p16, d16))
    assert jnp.allclose(s16.astype(jnp.float32), rs, atol=1e-1, rtol=1e-1)
    assert jnp.allclose(p16.astype(jnp.float32), rp, atol=1e-1, rtol=1e-1)
    assert jnp.allclose(d16.astype(jnp.float32), rd, atol=1e-1, rtol=1e-1)

    print("KERNEL_OK")
</pallas_src>

<mosaic_0001>
module attributes {stable_mosaic.version = 11 : i64} {
  func.func @_dme_kernel(%arg0: i32, %arg1: memref<104x48xf32, #tpu.memory_space<vmem>>, %arg2: memref<48x128xf32, #tpu.memory_space<vmem>>, %arg3: memref<1x128xf32, #tpu.memory_space<vmem>>, %arg4: memref<128x128xf32, #tpu.memory_space<vmem>>, %arg5: memref<1x128xf32, #tpu.memory_space<vmem>>, %arg6: memref<1x128xf32, #tpu.memory_space<vmem>>, %arg7: memref<128x128xf32, #tpu.memory_space<vmem>>, %arg8: memref<1x128xf32, #tpu.memory_space<vmem>>, %arg9: memref<64x64xf32, #tpu.memory_space<vmem>>, %arg10: memref<1x64xf32, #tpu.memory_space<vmem>>, %arg11: memref<104x128xf32, #tpu.memory_space<vmem>>) attributes {dimension_semantics = [#tpu.dimension_semantics<parallel>], iteration_bounds = array<i64: 2>, scalar_prefetch = 0 : i64, scratch_operands = 0 : i64, tpu.core_type = #tpu.core_type<tc>, window_params = [{transform_indices = @transform_0, window_bounds = array<i64: 104, 48>}, {pipeline_mode = #tpu.pipeline_mode<synchronous>, transform_indices = @transform_1, window_bounds = array<i64: 48, 128>}, {pipeline_mode = #tpu.pipeline_mode<synchronous>, transform_indices = @transform_2, window_bounds = array<i64: 1, 128>}, {pipeline_mode = #tpu.pipeline_mode<synchronous>, transform_indices = @transform_3, window_bounds = array<i64: 128, 128>}, {pipeline_mode = #tpu.pipeline_mode<synchronous>, transform_indices = @transform_4, window_bounds = array<i64: 1, 128>}, {pipeline_mode = #tpu.pipeline_mode<synchronous>, transform_indices = @transform_5, window_bounds = array<i64: 1, 128>}, {pipeline_mode = #tpu.pipeline_mode<synchronous>, transform_indices = @transform_6, window_bounds = array<i64: 128, 128>}, {pipeline_mode = #tpu.pipeline_mode<synchronous>, transform_indices = @transform_7, window_bounds = array<i64: 1, 128>}, {pipeline_mode = #tpu.pipeline_mode<synchronous>, transform_indices = @transform_8, window_bounds = array<i64: 64, 64>}, {pipeline_mode = #tpu.pipeline_mode<synchronous>, transform_indices = @transform_9, window_bounds = array<i64: 1, 64>}, {transform_indices = @transform_10, window_bounds = array<i64: 104, 128>}]} {
    %c0 = arith.constant 0 : index
    %c0_0 = arith.constant 0 : index
    %0 = vector.load %arg1[%c0, %c0_0] : memref<104x48xf32, #tpu.memory_space<vmem>>, vector<104x48xf32>
    %c0_1 = arith.constant 0 : index
    %c0_2 = arith.constant 0 : index
    %1 = vector.load %arg2[%c0_1, %c0_2] : memref<48x128xf32, #tpu.memory_space<vmem>>, vector<48x128xf32>
    %cst = arith.constant dense<0.000000e+00> : vector<104x128xf32>
    %2 = tpu.matmul %0, %1, %cst {dimension_numbers = #tpu.dot_dimension_numbers<[1], [0], [0], [1], [0, 0, 1, 1], [], []>} : vector<104x48xf32>, vector<48x128xf32>, vector<104x128xf32> -> vector<104x128xf32>
    %c0_3 = arith.constant 0 : index
    %c0_4 = arith.constant 0 : index
    %3 = vector.load %arg3[%c0_3, %c0_4] : memref<1x128xf32, #tpu.memory_space<vmem>>, vector<1x128xf32>
    %4 = vector.broadcast %3 : vector<1x128xf32> to vector<104x128xf32>
    %5 = arith.addf %2, %4 : vector<104x128xf32>
    %c0_5 = arith.constant 0 : index
    %c0_6 = arith.constant 0 : index
    %6 = vector.load %arg4[%c0_5, %c0_6] : memref<128x128xf32, #tpu.memory_space<vmem>>, vector<128x128xf32>
    %cst_7 = arith.constant dense<0.000000e+00> : vector<104x128xf32>
    %7 = tpu.matmul %5, %6, %cst_7 {dimension_numbers = #tpu.dot_dimension_numbers<[1], [0], [0], [1], [0, 0, 1, 1], [], []>} : vector<104x128xf32>, vector<128x128xf32>, vector<104x128xf32> -> vector<104x128xf32>
    %8 = arith.mulf %5, %5 : vector<104x128xf32>
    %cst_8 = arith.constant dense<0.000000e+00> : vector<104x128xf32>
    %9 = tpu.matmul %8, %6, %cst_8 {dimension_numbers = #tpu.dot_dimension_numbers<[1], [0], [0], [1], [0, 0, 1, 1], [], []>} : vector<104x128xf32>, vector<128x128xf32>, vector<104x128xf32> -> vector<104x128xf32>
    %10 = arith.mulf %7, %7 : vector<104x128xf32>
    %11 = arith.subf %9, %10 : vector<104x128xf32>
    %cst_9 = arith.constant 0.000000e+00 : f32
    %12 = vector.broadcast %cst_9 : f32 to vector<104x128xf32>
    %13 = arith.maximumf %11, %12 : vector<104x128xf32>
    %14 = arith.subf %5, %7 : vector<104x128xf32>
    %cst_10 = arith.constant 9.99999974E-6 : f32
    %15 = vector.broadcast %cst_10 : f32 to vector<104x128xf32>
    %16 = arith.addf %13, %15 : vector<104x128xf32>
    %17 = math.rsqrt %16 : vector<104x128xf32>
    %18 = arith.mulf %14, %17 : vector<104x128xf32>
    %c0_11 = arith.constant 0 : index
    %c0_12 = arith.constant 0 : index
    %19 = vector.load %arg5[%c0_11, %c0_12] : memref<1x128xf32, #tpu.memory_space<vmem>>, vector<1x128xf32>
    %20 = vector.broadcast %19 : vector<1x128xf32> to vector<104x128xf32>
    %21 = arith.mulf %18, %20 : vector<104x128xf32>
    %c0_13 = arith.constant 0 : index
    %c0_14 = arith.constant 0 : index
    %22 = vector.load %arg6[%c0_13, %c0_14] : memref<1x128xf32, #tpu.memory_space<vmem>>, vector<1x128xf32>
    %23 = vector.broadcast %22 : vector<1x128xf32> to vector<104x128xf32>
    %24 = arith.addf %21, %23 : vector<104x128xf32>
    %cst_15 = arith.constant 0.000000e+00 : f32
    %25 = vector.broadcast %cst_15 : f32 to vector<104x128xf32>
    %26 = arith.maximumf %24, %25 : vector<104x128xf32>
    %c0_16 = arith.constant 0 : index
    %c0_17 = arith.constant 0 : index
    %27 = vector.load %arg7[%c0_16, %c0_17] : memref<128x128xf32, #tpu.memory_space<vmem>>, vector<128x128xf32>
    %cst_18 = arith.constant dense<0.000000e+00> : vector<104x128xf32>
    %28 = tpu.matmul %26, %27, %cst_18 {dimension_numbers = #tpu.dot_dimension_numbers<[1], [0], [0], [1], [0, 0, 1, 1], [], []>} : vector<104x128xf32>, vector<128x128xf32>, vector<104x128xf32> -> vector<104x128xf32>
    %c0_19 = arith.constant 0 : index
    %c0_20 = arith.constant 0 : index
    %29 = vector.load %arg8[%c0_19, %c0_20] : memref<1x128xf32, #tpu.memory_space<vmem>>, vector<1x128xf32>
    %30 = vector.broadcast %29 : vector<1x128xf32> to vector<104x128xf32>
    %31 = arith.addf %28, %30 : vector<104x128xf32>
    %32 = vector.extract_strided_slice %31 {offsets = [0, 0], sizes = [104, 64], strides = [1, 1]} : vector<104x128xf32> to vector<104x64xf32>
    %c0_21 = arith.constant 0 : index
    %c0_22 = arith.constant 0 : index
    %33 = vector.load %arg11[%c0_21, %c0_22] : memref<104x128xf32, #tpu.memory_space<vmem>>, vector<104x64xf32>
    tpu.vector_store %arg11[%c0_21, %c0_22], %32 {strides = array<i32>} : memref<104x128xf32, #tpu.memory_space<vmem>>, vector<104x64xf32>,
    %34 = vector.extract_strided_slice %31 {offsets = [0, 64], sizes = [104, 64], strides = [1, 1]} : vector<104x128xf32> to vector<104x64xf32>
    %cst_23 = arith.constant 0.000000e+00 : f32
    %35 = vector.broadcast %cst_23 : f32 to vector<104x64xf32>
    %36 = arith.maximumf %34, %35 : vector<104x64xf32>
    %c0_24 = arith.constant 0 : index
    %c0_25 = arith.constant 0 : index
    %37 = vector.load %arg9[%c0_24, %c0_25] : memref<64x64xf32, #tpu.memory_space<vmem>>, vector<64x64xf32>
    %cst_26 = arith.constant dense<0.000000e+00> : vector<104x64xf32>
    %38 = tpu.matmul %36, %37, %cst_26 {dimension_numbers = #tpu.dot_dimension_numbers<[1], [0], [0], [1], [0, 0, 1, 1], [], []>} : vector<104x64xf32>, vector<64x64xf32>, vector<104x64xf32> -> vector<104x64xf32>
    %c0_27 = arith.constant 0 : index
    %c0_28 = arith.constant 0 : index
    %39 = vector.load %arg10[%c0_27, %c0_28] : memref<1x64xf32, #tpu.memory_space<vmem>>, vector<1x64xf32>
    %40 = vector.broadcast %39 : vector<1x64xf32> to vector<104x64xf32>
    %41 = arith.addf %38, %40 : vector<104x64xf32>
    %c0_29 = arith.constant 0 : index
    %c64 = arith.constant 64 : index
    %42 = vector.load %arg11[%c0_29, %c64] : memref<104x128xf32, #tpu.memory_space<vmem>>, vector<104x64xf32>
    tpu.vector_store %arg11[%c0_29, %c64], %41 {strides = array<i32>} : memref<104x128xf32, #tpu.memory_space<vmem>>, vector<104x64xf32>,
    return
  }
  func.func @transform_0(%arg0: i32) -> (i32, i32) {
    %c0_i32 = arith.constant 0 : i32
    %c0_i32_0 = arith.constant 0 : i32
    return %arg0, %c0_i32 : i32, i32
  }
  func.func @transform_1(%arg0: i32) -> (i32, i32) {
    %c0_i32 = arith.constant 0 : i32
    %c0_i32_0 = arith.constant 0 : i32
    %c0_i32_1 = arith.constant 0 : i32
    return %c0_i32, %c0_i32_0 : i32, i32
  }
  func.func @transform_2(%arg0: i32) -> (i32, i32) {
    %c0_i32 = arith.constant 0 : i32
    %c0_i32_0 = arith.constant 0 : i32
    %c0_i32_1 = arith.constant 0 : i32
    return %c0_i32, %c0_i32_0 : i32, i32
  }
  func.func @transform_3(%arg0: i32) -> (i32, i32) {
    %c0_i32 = arith.constant 0 : i32
    %c0_i32_0 = arith.constant 0 : i32
    %c0_i32_1 = arith.constant 0 : i32
    return %c0_i32, %c0_i32_0 : i32, i32
  }
  func.func @transform_4(%arg0: i32) -> (i32, i32) {
    %c0_i32 = arith.constant 0 : i32
    %c0_i32_0 = arith.constant 0 : i32
    %c0_i32_1 = arith.constant 0 : i32
    return %c0_i32, %c0_i32_0 : i32, i32
  }
  func.func @transform_5(%arg0: i32) -> (i32, i32) {
    %c0_i32 = arith.constant 0 : i32
    %c0_i32_0 = arith.constant 0 : i32
    %c0_i32_1 = arith.constant 0 : i32
    return %c0_i32, %c0_i32_0 : i32, i32
  }
  func.func @transform_6(%arg0: i32) -> (i32, i32) {
    %c0_i32 = arith.constant 0 : i32
    %c0_i32_0 = arith.constant 0 : i32
    %c0_i32_1 = arith.constant 0 : i32
    return %c0_i32, %c0_i32_0 : i32, i32
  }
  func.func @transform_7(%arg0: i32) -> (i32, i32) {
    %c0_i32 = arith.constant 0 : i32
    %c0_i32_0 = arith.constant 0 : i32
    %c0_i32_1 = arith.constant 0 : i32
    return %c0_i32, %c0_i32_0 : i32, i32
  }
  func.func @transform_8(%arg0: i32) -> (i32, i32) {
    %c0_i32 = arith.constant 0 : i32
    %c0_i32_0 = arith.constant 0 : i32
    %c0_i32_1 = arith.constant 0 : i32
    return %c0_i32, %c0_i32_0 : i32, i32
  }
  func.func @transform_9(%arg0: i32) -> (i32, i32) {
    %c0_i32 = arith.constant 0 : i32
    %c0_i32_0 = arith.constant 0 : i32
    %c0_i32_1 = arith.constant 0 : i32
    return %c0_i32, %c0_i32_0 : i32, i32
  }
  func.func @transform_10(%arg0: i32) -> (i32, i32) {
    %c0_i32 = arith.constant 0 : i32
    %c0_i32_0 = arith.constant 0 : i32
    return %arg0, %c0_i32 : i32, i32
  }
}

</mosaic_0001>

<bundles_post_ra>
// kernel: tpu_custom_call.1
= control target key start
LH: loop header
LB: loop body
LE: loop exit
PB: predicated region body
PF: predicated region fallthrough
CT: control target
= control target key end

     0   :  { %s3371_s0 = inlined_call_operand.vmem [shape: f32[200,48], index: 0, kind: input, shape index: {}]   ;;  %s3372_s1 = inlined_call_operand.hbm [shape: f32[48,128], index: 1, kind: input, shape index: {}]   ;;  %s3373_s2 = inlined_call_operand.vmem [shape: f32[1,128], index: 2, kind: input, shape index: {}]   ;;  %s3374_s3 = inlined_call_operand.vmem [shape: f32[128,128], index: 3, kind: input, shape index: {}]   ;;  %s3375_s4 = inlined_call_operand.vmem [shape: f32[1,128], index: 4, kind: input, shape index: {}]   ;;  %s3376_s5 = inlined_call_operand.hbm [shape: f32[1,128], index: 5, kind: input, shape index: {}]   ;;  %s3377_s6 = inlined_call_operand.vmem [shape: f32[128,128], index: 6, kind: input, shape index: {}]   ;;  %s3378_s7 = inlined_call_operand.hbm [shape: f32[1,128], index: 7, kind: input, shape index: {}]   ;;  %s3379_s8 = inlined_call_operand.vmem [shape: f32[64,64], index: 8, kind: input, shape index: {}]   ;;  %s3380_s9 = inlined_call_operand.vmem [shape: f32[1,64], index: 9, kind: input, shape index: {}]   ;;  %s3381_s10 = inlined_call_operand.hbm [shape: f32[200,128], index: 10, kind: output, shape index: {}]  }
   0x1   :  { %3388 = sst [smem:[#allocation16_spill]] %s3376_s5 }
   0x2   :  { %15 = vsyncpa [#allocation3], 0 }
   0x3   :  { %16 = vsyncpa [#allocation6], 0 }
   0x4   :  { %17 = vsyncpa [#allocation4], 0 }
   0x5   :  { %19 = vsyncpa [#allocation4 + $0x1], 0  ;;  %s2545_s13 = smov 0   ;;  %s2547_s14 = smov 0  }
   0x6   :  { %s2549_s15 = smov 0   ;;  %s2551_s16 = smov 0  }
   0x7 LB: > { %3389 = sst [smem:[#allocation12_spill]] %s2472_s15  ;;  %s2566_s17 = sadd.s32 4294967295, %s2476_s16   ;;  %s2476_s16 = sphi %s2551_s16, %s3407_s16   ;;  %s2472_s15 = sphi %s2549_s15, %s3409_s15   ;;  %s2468_s14 = sphi %s2547_s14, %s3411_s14   ;;  %s2464_s13 = sphi %s2545_s13, %s3410_s13  }
   0x8   : > { %s1623_s18 = sadd.s32 4294967294, %s2476_s16   ;;  %s2570_s19 = sadd.s32 1, %s2476_s16  }
   0x9   : > { %3390 = sst [smem:[#allocation13_spill]] %s2570_s19  ;;  %s247_s20 = sadd.s32 1, %s2472_s15 }
   0xa   : > { %s244_s21 = ssub.s32 %s2476_s16, %s2570_s19  ;;  %p257_p0 = scmp.ne.s32.totalorder %s2472_s15, %s2468_s14 }
   0xb   : > { %p245_p1 = scmp.eq.s32.totalorder %s244_s21, 0  ;;  %p258_p2 = scmp.eq.s32.totalorder %s2566_s17, 1 }
   0xc   : > { %p263_p3 = scmp.ne.s32.totalorder %s2468_s14, %s2464_s13  ;;  %p264_p4 = scmp.eq.s32.totalorder %s1623_s18, 1 }
   0xd   : > { %s2581_s22 = scalar_select %p245_p1, %s2472_s15, %s247_s20  }
   0xe   : > { %p2583_p5 = por %p258_p2, %p257_p0  ;;  %p2587_p6 = por %p264_p4, %p263_p3 }
   0xf   : > { %3391 = sst [smem:[#allocation14_spill]] %s2581_s22  ;;  %p1624_p7 = scmp.ge.s32.totalorder %s2476_s16, 1 }
  0x10   : > { %s3392_s23 = scalar_select %p2583_p5, 1, 0 }
  0x11   : > { %s3393_s24 = scalar_select %p2587_p6, 1, 0 }
  0x12   : > { %p271_p8 = scmp.lt.s32.totalorder %s2476_s16, 3  ;;  %p3383_p9 = scmp.eq.s32.totalorder %s2566_s17, 0 }
  0x13   : > { %3394 = sst [smem:[#allocation15_spill]] %s3393_s24  ;;  %s2478_s26 = smov [#allocation5]  }
  0x14   : > { %p2594_p10 = pnand %p1624_p7, %p271_p8  ;;  %s306_s27 = sshll.u32 %s2478_s26, 4  ;;  %s307_s27 = int_to_ptr.vmem [resolvable:$true] %s306_s27 }
  0x15   : > { %s2479_s28 = smov [#allocation2]   ;;  %s2480_s11 = smov [#allocation7]  }
  0x16   : > { %s3395_s25 = scalar_select %p2594_p10, 1, 0 }
  0x17   : > { %p2232_p11 = pneg %p2594_p10  ;;  %s283_s29 = sshll.u32 %s2479_s28, 4  ;;  %s2606_s29 = int_to_ptr.vmem [resolvable:$true] %s283_s29 }
  0x18   : > { %s2608_s12 = sshll.u32 %s2480_s11, 4  ;;  %s3397_s5 = sld [smem:[#allocation16_spill]]  ;;  %s321_s12 = int_to_ptr.vmem [resolvable:$true] %s2608_s12 }
  0x19   : > { %p2602_p12 = pnand %p3383_p9, %p2232_p11 }
  0x1b   : > { %p2618_p0 = pneg %p2602_p12 }
  0x1e   : > { %s2322_s21 = scalar_lea.hbm %s3397_s5, 16 }
  0x1f   : > { %p2323_p13 = scmp.ne.s32.totalorder %s3397_s5, %s2322_s21  ;;  %p2329_p3 = scmp.lt.u32.totalorder %s2322_s21, %s3397_s5 }
  0x21   : > { %p2325_p1 = pnand %p2618_p0, %p2323_p13 }
  0x23   : > { %p2326_p2 = pneg %p2325_p1 }
  0x25   : > { %p2331_p4 = pnand %p2329_p3, %p2326_p2 }
  0x27   : > { %2334 = shalt.err (!%p2331_p4)
}
  0x28   : > { %s2335_s18 = scalar_lea.vmem %s307_s27, 16  ;;  %s2342_s22 = scalar_lea.vmem %s307_s27, 32 }
  0x29   : > { %p2336_p7 = scmp.ne.s32.totalorder %s307_s27, %s2335_s18  ;;  %p2343_p9 = scmp.lt.s32.totalorder %s307_s27, %s307_s27 }
  0x2a   : > { %p2344_p6 = scmp.lt.s32.totalorder %s2342_s22, %s2335_s18 }
  0x2b   : > { %p2338_p8 = pnand %p2336_p7, %p2618_p0 }
  0x2c   : > { %p2345_p5 = por %p2344_p6, %p2343_p9 }
  0x2d   : > { %p2339_p11 = pneg %p2338_p8 }
  0x2f   : > { %p2346_p10 = pnand %p2345_p5, %p2339_p11 }
  0x31   : > { %2349 = shalt.err (!%p2346_p10)
}
  0x32   : > { %2238 = dma.hbm_to_vmem [thread:$0]  (!%p2602_p12), %s3397_s5, 16, %s307_s27, [#allocation6]  }
  0x33   : > { %s2350_s11 = scalar_lea.hbm %s3372_s1, 768 }
  0x34   : > { %p2351_p13 = scmp.ne.s32.totalorder %s3372_s1, %s2350_s11  ;;  %p2357_p5 = scmp.lt.u32.totalorder %s2350_s11, %s3372_s1 }
  0x36   : > { %p2353_p1 = pnand %p2351_p13, %p2618_p0 }
  0x38   : > { %p2354_p6 = pneg %p2353_p1 }
  0x3a   : > { %p2359_p9 = pnand %p2357_p5, %p2354_p6 }
  0x3c   : > { %2362 = shalt.err (!%p2359_p9)
}
  0x3d   : > { %s2363_s27 = scalar_lea.vmem %s2606_s29, 768  ;;  %p2371_p4 = scmp.lt.s32.totalorder %s2606_s29, %s2606_s29 }
  0x3e   : > { %p2364_p10 = scmp.ne.s32.totalorder %s2606_s29, %s2363_s27  ;;  %p2372_p7 = scmp.lt.s32.totalorder %s2363_s27, %s2363_s27 }
  0x40   : > { %p2366_p2 = pnand %p2364_p10, %p2618_p0  ;;  %p2373_p8 = por %p2372_p7, %p2371_p4 }
  0x42   : > { %p2367_p3 = pneg %p2366_p2 }
  0x44   : > { %p2374_p11 = pnand %p2373_p8, %p2367_p3 }
  0x46   : > { %2377 = shalt.err (!%p2374_p11)
}
  0x47   : > { %s2481_s19 = smov 128   ;;  %s2482_s24 = smov 8  }
  0x48   : > { %2235 = dma.hbm_to_vmem [thread:$0]  (!%p2602_p12), %s3372_s1, 768, %s2606_s29, [#allocation3], %s2481_s19, %s2481_s19, %s2482_s24  }
  0x49   : > { %s2378_s11 = scalar_lea.hbm %s3378_s7, 16 }
  0x4a   : > { %p2379_p13 = scmp.ne.s32.totalorder %s3378_s7, %s2378_s11  ;;  %p2385_p5 = scmp.lt.u32.totalorder %s2378_s11, %s3378_s7 }
  0x4c   : > { %p2381_p1 = pnand %p2379_p13, %p2618_p0 }
  0x4e   : > { %p2382_p6 = pneg %p2381_p1 }
  0x50   : > { %p2387_p9 = pnand %p2385_p5, %p2382_p6 }
  0x52   : > { %2390 = shalt.err (!%p2387_p9)
}
  0x53   : > { %s2391_s20 = scalar_lea.vmem %s321_s12, 16  ;;  %s2398_s29 = scalar_lea.vmem %s321_s12, 32 }
  0x54   : > { %p2392_p10 = scmp.ne.s32.totalorder %s321_s12, %s2391_s20  ;;  %p2399_p4 = scmp.lt.s32.totalorder %s321_s12, %s321_s12 }
  0x55   : > { %p2400_p7 = scmp.lt.s32.totalorder %s2398_s29, %s2391_s20 }
  0x56   : > { %p2394_p2 = pnand %p2392_p10, %p2618_p0 }
  0x57   : > { %p2401_p8 = por %p2400_p7, %p2399_p4 }
  0x58   : > { %p2395_p3 = pneg %p2394_p2 }
  0x5a   : > { %p2402_p11 = pnand %p2401_p8, %p2395_p3 }
  0x5c   : > { %2405 = shalt.err (!%p2402_p11)
}
  0x5d   : > { %2241 = dma.hbm_to_vmem [thread:$0]  (!%p2602_p12), %s3378_s7, 16, %s321_s12, [#allocation6]  }
  0x5e   : > { %p3399_p13 = scmp.ne.s32.totalorder %s3395_s25, 0 }
  0x5f   : > { %p3400_p1 = scmp.eq.s32.totalorder (!%p3399_p13), %s2566_s17, 0 }
  0x60   : > { %356 = sbr.rel (%p3399_p13) target bundleno = 1313 (0x521), region = 60 }
  0x67   : > { %2451 = dma.done.wait (%p3400_p1), [#allocation3], 768   ;;  %p3401_p0 = pmov %p3400_p1 }
  0x69   : > { %2453 = vsyncadd (%p3401_p0), [#allocation3], 4294966528  ;;  %p3402_p6 = pmov %p3401_p0 }
  0x6a   : > { %p3403_p5 = pmov %p3401_p0 }
  0x6b   : > { %2455 = dma.done.wait (%p3402_p6), [#allocation6], 32  }
  0x6c   : > { %2457 = vsyncadd (%p3403_p5), [#allocation6], 4294967264  ;;  %s2687_s5 = smul.u32 13, %s2566_s17  ;;  %v2483_v0 = vmov 0.0|0.0   ;;  %vm2484_vm0 = vmmov 0   ;;  %v2485_v1 = vmov 0.0  }
  0x6d   : > { %2119 = vmatprep.subr.bf16.mxu0 %v2483_v0  ;;  %1812 = vmatprep.mubr.msk.f32.mxu0 %vm2484_vm0, %v2485_v1  ;;  %v438_v2 = vld [vmem:[#allocation2] sm:$0xff]  ;;  %v439_v3 = vld [vmem:[#allocation2 + $0x8] sm:$0xff]  ;;  %v440_v4 = vld [vmem:[#allocation2 + $0x10] sm:$0xff]  ;;  %vm451_vm1 = vcmask 392192   ;;  %s403_s24 = sand.u32 1, %s2468_s14   ;;  %vm1207_vm2 = vcmask 523264  }
  0x6e   : > { %2212 = vmatprep.subr.bf16.mxu1 %v2483_v0  ;;  %1836 = vmatprep.mubr.msk.f32.mxu1 %vm2484_vm0, %v2485_v1  ;;  %p411_p12 = scmp.lt.s32.totalorder %s2687_s5, 24  ;;  %v2120_v5 = vpack.c.bf16 %v439_v3, %v438_v2  ;;  %v441_v6 = vld [vmem:[#allocation2 + $0x18] sm:$0xff]  ;;  %v442_v8 = vld [vmem:[#allocation2 + $0x20] sm:$0xff]  ;;  %v443_v9 = vld [vmem:[#allocation2 + $0x28] sm:$0xff]  ;;  %s2218_s12 = smul.u32 104, %s403_s24  ;;  %vm1496_vm3 = vcmask 1048064  }
  0x6f   : > { %v2123_v7 = vpack.c.bf16 %v441_v6, %v440_v4  ;;  %v2126_v10 = vpack.c.bf16 %v443_v9, %v442_v8  ;;  %v621_v11 = vld [vmem:[%s3374_s3] sm:$0xff]  ;;  %v622_v12 = vld [vmem:[%s3374_s3 + $0x8] sm:$0xff]  ;;  %v623_v16 = vld [vmem:[%s3374_s3 + $0x10] sm:$0xff]  ;;  %s2486_s15 = smov 64   ;;  %s3310_s18 = scalar_lea.sflag [#allocation4], %s403_s24 }
  0x70   : > { %s412_s25 = scalar_select %p411_p12, %s2687_s5, 24  ;;  %2121 = vmatpush3.bf16.msra.mxu0 %v2120_v5  ;;  %2215 = vmatpush3.bf16.msra.mxu1 %v2120_v5  ;;  %v2129_v15 = vpack.c.bf16 %v622_v12, %v621_v11  ;;  %v624_v17 = vld [vmem:[%s3374_s3 + $0x18] sm:$0xff]  ;;  %v625_v21 = vld [vmem:[%s3374_s3 + $0x20] sm:$0xff]  ;;  %v626_v22 = vld [vmem:[%s3374_s3 + $0x28] sm:$0xff] }
  0x71   : > { %2122 = vmatprep.subr.bf16.mxu0 %v2483_v0  ;;  %2213 = vmatprep.subr.bf16.mxu1 %v2483_v0  ;;  %v2132_v20 = vpack.c.bf16 %v624_v17, %v623_v16  ;;  %v2135_v25 = vpack.c.bf16 %v626_v22, %v625_v21  ;;  %v627_v26 = vld [vmem:[%s3374_s3 + $0x30] sm:$0xff]  ;;  %v628_v27 = vld [vmem:[%s3374_s3 + $0x38] sm:$0xff]  ;;  %v629_v31 = vld [vmem:[%s3374_s3 + $0x40] sm:$0xff]  ;;  %s3176_s28 = scalar_lea.vmem [#allocation8], %s2218_s12  ;;  %p3404_p9 = scmp.ne.s32.totalorder %s3392_s23, 0 }
  0x72   : > { %s1633_s30 = sshll.u32 %s412_s25, 3  ;;  %v2138_v30 = vpack.c.bf16 %v628_v27, %v627_v26  ;;  %v630_v32 = vld [vmem:[%s3374_s3 + $0x48] sm:$0xff]  ;;  %v631_v36 = vld [vmem:[%s3374_s3 + $0x50] sm:$0xff]  ;;  %v632_v37 = vld [vmem:[%s3374_s3 + $0x58] sm:$0xff] }
  0x73   : > { %s2703_s26 = scalar_lea.vmem %s3371_s0, %s1633_s30  ;;  %v2141_v35 = vpack.c.bf16 %v630_v32, %v629_v31  ;;  %v2144_v39 = vpack.c.bf16 %v632_v37, %v631_v36  ;;  %v633_v40 = vld [vmem:[%s3374_s3 + $0x60] sm:$0xff]  ;;  %v634_v41 = vld [vmem:[%s3374_s3 + $0x68] sm:$0xff]  ;;  %v635_v45 = vld [vmem:[%s3374_s3 + $0x70] sm:$0xff] }
  0x74   : > { %2124 = vmatpush3.bf16.msra.mxu0 %v2123_v7  ;;  %2216 = vmatpush3.bf16.msra.mxu1 %v2123_v7  ;;  %v425_v13 = vld [vmem:[%s2703_s26] sm:$0xff]  ;;  %v426_v18 = vld [vmem:[%s2703_s26 + $0x8] sm:$0xff]  ;;  %v427_v23 = vld [vmem:[%s2703_s26 + $0x10] sm:$0xff]  ;;  %v2147_v43 = vpack.c.bf16 %v634_v41, %v633_v40 }
  0x75   : > { %2125 = vmatprep.subr.bf16.mxu0 %v2483_v0  ;;  %2214 = vmatprep.subr.bf16.mxu1 %v2483_v0  ;;  %v433_v14 = vld [vmem:[%s2703_s26 + $0x40] sm:$0xff]  ;;  %v434_v19 = vld [vmem:[%s2703_s26 + $0x48] sm:$0xff]  ;;  %v435_v24 = vld [vmem:[%s2703_s26 + $0x50] sm:$0xff] }
  0x76   : > { %v428_v28 = vld [vmem:[%s2703_s26 + $0x18] sm:$0xff]  ;;  %v429_v33 = vld [vmem:[%s2703_s26 + $0x20] sm:$0xff]  ;;  %v430_v38 = vld [vmem:[%s2703_s26 + $0x28] sm:$0xff] }
  0x77   : > { %v436_v29 = vld [vmem:[%s2703_s26 + $0x58] sm:$0xff]  ;;  %v437_v34 = vld [vmem:[%s2703_s26 + $0x60] sm:$0xff]  ;;  %v431_v42 = vld [vmem:[%s2703_s26 + $0x30] sm:$0xff] }
  0x78   : > { %2127 = vmatpush3.bf16.msra.mxu0 %v2126_v10  ;;  %2217 = vmatpush3.bf16.msra.mxu1 %v2126_v10  ;;  %v432_v44 = vld [vmem:[%s2703_s26 + $0x38] sm:$0xff]  ;;  %v1054_v48 = vld [vmem:[%s3377_s6] sm:$0xff]  ;;  %v1055_v49 = vld [vmem:[%s3377_s6 + $0x8] sm:$0xff]  ;;  %s1519_s26 = ssub.s32 (%p3404_p9), 25, %s2687_s5 }
  0x79   : > { %2128 = vmatprep.subr.bf16.mxu1 %v2483_v0  ;;  %2152 = vmatprep.subr.bf16.mxu0 %v2483_v0  ;;  %v636_v46 = vld [vmem:[%s3374_s3 + $0x78] sm:$0xff]  ;;  %v2833_v50 = vld [vmem:[%s3373_s2] ss:$0 sm:$0xff]  ;;  %v2177_v53 = vpack.c.bf16 %v1055_v49, %v1054_v48  ;;  %v1056_v57 = vld [vmem:[%s3377_s6 + $0x10] sm:$0xff]  ;;  %p1520_p10 = scmp.lt.s32.totalorder (%p3404_p9), %s1519_s26, 13 }
  0x7a   : > { %v2150_v47 = vpack.c.bf16 %v636_v46, %v635_v45  ;;  %v1057_v58 = vld [vmem:[%s3377_s6 + $0x18] sm:$0xff]  ;;  %v1058_v4 = vld [vmem:[%s3377_s6 + $0x20] sm:$0xff]  ;;  %v1059_v5 = vld [vmem:[%s3377_s6 + $0x28] sm:$0xff] }
  0x7b   : > { %1813 = vmatmul.mubr.msk.f32.vlgmr.msra.gmra.mrb[0].mxu0 %vm451_vm1, %v425_v13  ;;  %1837 = vmatmul.mubr.msk.f32.vlgmr.msra.gmra.mrb[0].mxu1 %vm451_vm1, %v433_v14  ;;  %v2180_v62 = vpack.c.bf16 %v1057_v58, %v1056_v57  ;;  %v2183_v9 = vpack.c.bf16 %v1059_v5, %v1058_v4  ;;  %v1060_v13 = vld [vmem:[%s3377_s6 + $0x30] sm:$0xff]  ;;  %v1061_v14 = vld [vmem:[%s3377_s6 + $0x38] sm:$0xff]  ;;  %v1066_v58 = vld [vmem:[%s3377_s6 + $0x60] sm:$0xff] }
  0x7c   : > { %1815 = vmatprep.mubr.msk.f32.mxu0 %vm2484_vm0, %v2485_v1  ;;  %1839 = vmatprep.mubr.msk.f32.mxu1 %vm2484_vm0, %v2485_v1 }
  0x7d   : > { %2130 = vmatpush3.bf16.msra.mxu1 %v2129_v15  ;;  %2154 = vmatpush3.bf16.msra.mxu0 %v2129_v15 }
  0x7e   : > { %2131 = vmatprep.subr.bf16.mxu1 %v2483_v0  ;;  %2155 = vmatprep.subr.bf16.mxu0 %v2483_v0 }
  0x7f   : > { %1816 = vmatmul.mubr.msk.f32.gmra.mrb[2].mxu0 %vm451_vm1, %v426_v18  ;;  %1840 = vmatmul.mubr.msk.f32.gmra.mrb[2].mxu1 %vm451_vm1, %v434_v19  ;;  %v2186_v18 = vpack.c.bf16 %v1061_v14, %v1060_v13 }
  0x80   : > { %1818 = vmatprep.mubr.msk.f32.mxu0 %vm2484_vm0, %v2485_v1  ;;  %1842 = vmatprep.mubr.msk.f32.mxu1 %vm2484_vm0, %v2485_v1 }
  0x81   : > { %2133 = vmatpush3.bf16.msra.mxu1 %v2132_v20  ;;  %2157 = vmatpush3.bf16.msra.mxu0 %v2132_v20 }
  0x82   : > { %2134 = vmatprep.subr.bf16.mxu1 %v2483_v0  ;;  %2158 = vmatprep.subr.bf16.mxu0 %v2483_v0 }
  0x83   : > { %1819 = vmatmul.mubr.msk.f32.gmra.mrb[4].mxu0 %vm451_vm1, %v427_v23  ;;  %1843 = vmatmul.mubr.msk.f32.gmra.mrb[4].mxu1 %vm451_vm1, %v435_v24 }
  0x84   : > { %1821 = vmatprep.mubr.msk.f32.mxu0 %vm2484_vm0, %v2485_v1  ;;  %1845 = vmatprep.mubr.msk.f32.mxu1 %vm2484_vm0, %v2485_v1 }
  0x85   : > { %2136 = vmatpush3.bf16.msra.mxu1 %v2135_v25  ;;  %2160 = vmatpush3.bf16.msra.mxu0 %v2135_v25 }
  0x86   : > { %2137 = vmatprep.subr.bf16.mxu1 %v2483_v0  ;;  %2161 = vmatprep.subr.bf16.mxu0 %v2483_v0 }
  0x87   : > { %1822 = vmatmul.mubr.msk.f32.gmra.mrb[6].mxu0 %vm451_vm1, %v428_v28  ;;  %1846 = vmatmul.mubr.msk.f32.gmra.mrb[6].mxu1 %vm451_vm1, %v436_v29 }
  0x88   : > { %1824 = vmatprep.mubr.msk.f32.mxu0 %vm2484_vm0, %v2485_v1  ;;  %1848 = vmatprep.mubr.msk.f32.mxu1 %vm2484_vm0, %v2485_v1 }
  0x89   : > { %2139 = vmatpush3.bf16.msra.mxu1 %v2138_v30  ;;  %2163 = vmatpush3.bf16.msra.mxu0 %v2138_v30 }
  0x8a   : > { %2140 = vmatprep.subr.bf16.mxu1 %v2483_v0  ;;  %2164 = vmatprep.subr.bf16.mxu0 %v2483_v0 }
  0x8b   : > { %1825 = vmatmul.mubr.msk.f32.gmra.mrb[8].mxu0 %vm451_vm1, %v429_v33  ;;  %1849 = vmatmul.mubr.msk.f32.gmra.mrb[8].mxu1 %vm451_vm1, %v437_v34 }
  0x8c   : > { %1827 = vmatprep.mubr.msk.f32.mxu0 %vm2484_vm0, %v2485_v1  ;;  %1883 = vmatprep.mubr.msk.f32.mxu1 %vm2484_vm0, %v2485_v1 }
  0x8d   : > { %2142 = vmatpush3.bf16.msra.mxu1 %v2141_v35  ;;  %2166 = vmatpush3.bf16.msra.mxu0 %v2141_v35 }
  0x8e   : > { %2143 = vmatprep.subr.bf16.mxu1 %v2483_v0  ;;  %2167 = vmatprep.subr.bf16.mxu0 %v2483_v0 }
  0x8f   : > { %1828 = vmatmul.mubr.msk.f32.gmra.mrb[10].mxu0 %vm451_vm1, %v430_v38 }
  0x90   : > { %1830 = vmatprep.mubr.msk.f32.mxu0 %vm2484_vm0, %v2485_v1 }
  0x91   : > { %2145 = vmatpush3.bf16.msra.mxu1 %v2144_v39  ;;  %2169 = vmatpush3.bf16.msra.mxu0 %v2144_v39 }
  0x92   : > { %2146 = vmatprep.subr.bf16.mxu1 %v2483_v0  ;;  %2170 = vmatprep.subr.bf16.mxu0 %v2483_v0 }
  0x93   : > { %1831 = vmatmul.mubr.msk.f32.gmra.mrb[12].mxu0 %vm451_vm1, %v431_v42 }
  0x94   : > { %1833 = vmatprep.mubr.msk.f32.mxu0 %vm2484_vm0, %v2485_v1 }
  0x95   : > { %2148 = vmatpush3.bf16.msra.mxu1 %v2147_v43  ;;  %2172 = vmatpush3.bf16.msra.mxu0 %v2147_v43 }
  0x96   : > { %2149 = vmatprep.subr.bf16.mxu1 %v2483_v0  ;;  %2173 = vmatprep.subr.bf16.mxu0 %v2483_v0 }
  0x97   : > { %1834 = vmatmul.mubr.msk.f32.gmra.mrb[14].mxu0 %vm451_vm1, %v432_v44 }
  0x98   : > { %1954 = vmatprep.mubr.msk.f32.mxu0 %vm2484_vm0, %v2485_v1 }
  0x99   : > { %2151 = vmatpush3.bf16.msra.mxu1 %v2150_v47  ;;  %2175 = vmatpush3.bf16.msra.mxu0 %v2150_v47 }
  0x9a   : > { %2176 = vmatprep.subr.bf16.mxu1 %v2483_v0  ;;  %2200 = vmatprep.subr.bf16.mxu0 %v2483_v0 }
 0x14e   : > { %v557_v51 = vpop.f32.mrb[0].mxu0  ;;  %v2835_v52 = vpop.f32.mrb[0].mxu1 }
 0x14f   : > { %v2838_v54 = vadd.f32 %v2833_v50, %v557_v51  ;;  %v1814_v55 = vpop.f32.mrb[1].mxu0  ;;  %v1838_v56 = vpop.f32.mrb[1].mxu1  ;;  %v2936_v40 = vadd.f32 %v2833_v50, %v2835_v52  ;;  %v1063_v52 = vld [vmem:[%s3377_s6 + $0x48] sm:$0xff] }
 0x150   : > { %v1064_v55 = vld [vmem:[%s3377_s6 + $0x50] sm:$0xff]  ;;  %v1065_v56 = vld [vmem:[%s3377_s6 + $0x58] sm:$0xff] }
 0x151   : > { %v767_v59 = vmul.f32 %v2838_v54, %v2838_v54  ;;  %1884 = vmatmul.mubr.f32.vlgmr.msra.gmra.mrb[10].mxu1 %v2838_v54  ;;  %v775_v43 = vmul.f32 %v2936_v40, %v2936_v40  ;;  %v2192_v57 = vpack.c.bf16 %v1065_v56, %v1064_v55  ;;  %v3039_v55 = vld [vmem:[%s3375_s4] ss:$0 sm:$0xff] }
 0x152   : > { %v562_v60 = vpop.f32.mrb[2].mxu0  ;;  %1886 = vmatprep.mubr.msk.f32.mxu1 %vm2484_vm0, %v2485_v1  ;;  %v2851_v61 = vpop.f32.mrb[2].mxu1  ;;  %2178 = vmatpush3.bf16.msra.mxu1 %v2177_v53 }
 0x153   : > { %v2854_v63 = vadd.f32 %v2833_v50, %v562_v60  ;;  %v1817_v2 = vpop.f32.mrb[3].mxu0  ;;  %1955 = vmatmul.mubr.f32.vlgmr.msra.gmra.mrb[16].mxu0 %v767_v59  ;;  %v1841_v3 = vpop.f32.mrb[3].mxu1  ;;  %2179 = vmatprep.subr.bf16.mxu1 %v2483_v0  ;;  %v2947_v42 = vadd.f32 %v2833_v50, %v2851_v61  ;;  %v1067_v59 = vld [vmem:[%s3377_s6 + $0x68] sm:$0xff]  ;;  %v1068_v61 = vld [vmem:[%s3377_s6 + $0x70] sm:$0xff] }
 0x154   : > { %1957 = vmatprep.mubr.msk.f32.mxu0 %vm2484_vm0, %v2485_v1  ;;  %v2195_v60 = vpack.c.bf16 %v1067_v59, %v1066_v58 }
 0x155   : > { %1887 = vmatmul.mubr.f32.gmra.mrb[12].mxu1 %v2854_v63  ;;  %v768_v6 = vmul.f32 %v2854_v63, %v2854_v63  ;;  %v776_v45 = vmul.f32 %v2947_v42, %v2947_v42 }
 0x156   : > { %v567_v7 = vpop.f32.mrb[4].mxu0  ;;  %1889 = vmatprep.mubr.msk.f32.mxu1 %vm2484_vm0, %v2485_v1  ;;  %v2870_v8 = vpop.f32.mrb[4].mxu1  ;;  %2181 = vmatpush3.bf16.msra.mxu1 %v2180_v62  ;;  %v1069_v62 = vld [vmem:[%s3377_s6 + $0x78] sm:$0xff] }
 0x157   : > { %v2873_v10 = vadd.f32 %v2833_v50, %v567_v7  ;;  %v1820_v11 = vpop.f32.mrb[5].mxu0  ;;  %1958 = vmatmul.mubr.f32.gmra.mrb[18].mxu0 %v768_v6  ;;  %v1844_v12 = vpop.f32.mrb[5].mxu1  ;;  %2182 = vmatprep.subr.bf16.mxu1 %v2483_v0  ;;  %v2958_v44 = vadd.f32 %v2833_v50, %v2870_v8  ;;  %v2198_v2 = vpack.c.bf16 %v1069_v62, %v1068_v61 }
 0x158   : > { %1960 = vmatprep.mubr.msk.f32.mxu0 %vm2484_vm0, %v2485_v1 }
 0x159   : > { %1890 = vmatmul.mubr.f32.gmra.mrb[14].mxu1 %v2873_v10  ;;  %v769_v15 = vmul.f32 %v2873_v10, %v2873_v10  ;;  %v777_v47 = vmul.f32 %v2958_v44, %v2958_v44 }
 0x15a   : > { %v572_v16 = vpop.f32.mrb[6].mxu0  ;;  %1892 = vmatprep.mubr.msk.f32.mxu1 %vm2484_vm0, %v2485_v1  ;;  %v612_v17 = vpop.f32.mrb[6].mxu1  ;;  %2184 = vmatpush3.bf16.msra.mxu1 %v2183_v9 }
 0x15b   : > { %v2890_v19 = vadd.f32 %v2833_v50, %v572_v16  ;;  %v1823_v20 = vpop.f32.mrb[7].mxu0  ;;  %1961 = vmatmul.mubr.f32.gmra.mrb[20].mxu0 %v769_v15  ;;  %v1847_v21 = vpop.f32.mrb[7].mxu1  ;;  %2185 = vmatprep.subr.bf16.mxu1 %v2483_v0  ;;  %v2968_v46 = vadd.f32 %v2833_v50, %v612_v17 }
 0x15c   : > { %1963 = vmatprep.mubr.msk.f32.mxu0 %vm2484_vm0, %v2485_v1 }
 0x15d   : > { %1893 = vmatmul.mubr.f32.gmra.mrb[16].mxu1 %v2890_v19  ;;  %v770_v22 = vmul.f32 %v2890_v19, %v2890_v19  ;;  %v778_v49 = vmul.f32 %v2968_v46, %v2968_v46 }
 0x15e   : > { %v577_v23 = vpop.f32.mrb[8].mxu0  ;;  %1895 = vmatprep.mubr.msk.f32.mxu1 %vm2484_vm0, %v2485_v1  ;;  %v617_v24 = vpop.f32.mrb[8].mxu1  ;;  %2187 = vmatpush3.bf16.msra.mxu1 %v2186_v18 }
 0x15f   : > { %v2901_v25 = vadd.f32 %v2833_v50, %v577_v23  ;;  %v1826_v26 = vpop.f32.mrb[9].mxu0  ;;  %1964 = vmatmul.mubr.f32.gmra.mrb[22].mxu0 %v770_v22  ;;  %v1850_v27 = vpop.f32.mrb[9].mxu1  ;;  %2188 = vmatprep.subr.bf16.mxu1 %v2483_v0  ;;  %v2978_v48 = vadd.f32 %v2833_v50, %v617_v24 }
 0x160   : > { %1966 = vmatprep.mubr.msk.f32.mxu0 %vm2484_vm0, %v2485_v1 }
 0x161   : > { %1896 = vmatmul.mubr.f32.gmra.mrb[18].mxu1 %v2901_v25  ;;  %v771_v28 = vmul.f32 %v2901_v25, %v2901_v25  ;;  %v779_v51 = vmul.f32 %v2978_v48, %v2978_v48 }
 0x162   : > { %v582_v29 = vpop.f32.mrb[10].mxu0  ;;  %1898 = vmatprep.mubr.msk.f32.mxu1 %vm2484_vm0, %v2485_v1 }
 0x163   : > { %v2912_v30 = vadd.f32 %v2833_v50, %v582_v29  ;;  %v1829_v31 = vpop.f32.mrb[11].mxu0  ;;  %1967 = vmatmul.mubr.f32.gmra.mrb[24].mxu0 %v771_v28 }
 0x164   : > { %1969 = vmatprep.mubr.msk.f32.mxu0 %vm2484_vm0, %v2485_v1 }
 0x165   : > { %1899 = vmatmul.mubr.f32.gmra.mrb[20].mxu1 %v2912_v30  ;;  %v772_v32 = vmul.f32 %v2912_v30, %v2912_v30 }
 0x166   : > { %v587_v33 = vpop.f32.mrb[12].mxu0  ;;  %1901 = vmatprep.mubr.msk.f32.mxu1 %vm2484_vm0, %v2485_v1 }
 0x167   : > { %v2922_v34 = vadd.f32 %v2833_v50, %v587_v33  ;;  %v1832_v35 = vpop.f32.mrb[13].mxu0  ;;  %1970 = vmatmul.mubr.f32.gmra.mrb[26].mxu0 %v772_v32 }
 0x168   : > { %1972 = vmatprep.mubr.msk.f32.mxu0 %vm2484_vm0, %v2485_v1 }
 0x169   : > { %1902 = vmatmul.mubr.f32.gmra.mrb[22].mxu1 %v2922_v34  ;;  %v773_v36 = vmul.f32 %v2922_v34, %v2922_v34 }
 0x16a   : > { %v592_v37 = vpop.f32.mrb[14].mxu0  ;;  %1904 = vmatprep.mubr.msk.f32.mxu1 %vm2484_vm0, %v2485_v1 }
 0x16b   : > { %v2932_v38 = vadd.f32 %v2833_v50, %v592_v37  ;;  %v1835_v39 = vpop.f32.mrb[15].mxu0  ;;  %1973 = vmatmul.mubr.f32.gmra.mrb[28].mxu0 %v773_v36  ;;  %v1062_v50 = vld [vmem:[%s3377_s6 + $0x40] sm:$0xff] }
 0x16c   : > { %1975 = vmatprep.mubr.msk.f32.mxu0 %vm2484_vm0, %v2485_v1  ;;  %v2189_v53 = vpack.c.bf16 %v1063_v52, %v1062_v50 }
 0x16d   : > { %1905 = vmatmul.mubr.f32.gmra.mrb[24].mxu1 %v2932_v38  ;;  %v774_v41 = vmul.f32 %v2932_v38, %v2932_v38 }
 0x16e   : > { %1907 = vmatprep.mubr.msk.f32.mxu1 %vm2484_vm0, %v2485_v1  ;;  %2190 = vmatpush3.bf16.msra.mxu1 %v2189_v53 }
 0x16f   : > { %1976 = vmatmul.mubr.f32.gmra.mrb[30].mxu0 %v774_v41  ;;  %2191 = vmatprep.subr.bf16.mxu1 %v2483_v0 }
 0x170   : > { %1978 = vmatprep.mubr.msk.f32.mxu0 %vm2484_vm0, %v2485_v1 }
 0x171   : > { %1908 = vmatmul.mubr.f32.gmra.mrb[26].mxu1 %v2936_v40 }
 0x172   : > { %1910 = vmatprep.mubr.msk.f32.mxu1 %vm2484_vm0, %v2485_v1  ;;  %2193 = vmatpush3.bf16.msra.mxu1 %v2192_v57 }
 0x173   : > { %1979 = vmatmul.mubr.f32.gmra.mrb[32].mxu0 %v775_v43  ;;  %2194 = vmatprep.subr.bf16.mxu1 %v2483_v0 }
 0x174   : > { %1981 = vmatprep.mubr.msk.f32.mxu0 %vm2484_vm0, %v2485_v1 }
 0x175   : > { %1911 = vmatmul.mubr.f32.gmra.mrb[28].mxu1 %v2947_v42 }
 0x176   : > { %1913 = vmatprep.mubr.msk.f32.mxu1 %vm2484_vm0, %v2485_v1  ;;  %2196 = vmatpush3.bf16.msra.mxu1 %v2195_v60 }
 0x177   : > { %1982 = vmatmul.mubr.f32.gmra.mrb[34].mxu0 %v776_v45  ;;  %2197 = vmatprep.subr.bf16.mxu1 %v2483_v0 }
 0x178   : > { %1984 = vmatprep.mubr.msk.f32.mxu0 %vm2484_vm0, %v2485_v1 }
 0x179   : > { %1914 = vmatmul.mubr.f32.gmra.mrb[30].mxu1 %v2958_v44 }
 0x17a   : > { %1916 = vmatprep.mubr.msk.f32.mxu1 %vm2484_vm0, %v2485_v1  ;;  %2199 = vmatpush3.bf16.msra.mxu1 %v2198_v2 }
 0x17b   : > { %1985 = vmatmul.mubr.f32.gmra.mrb[36].mxu0 %v777_v47 }
 0x17c   : > { %1987 = vmatprep.mubr.msk.f32.mxu0 %vm2484_vm0, %v2485_v1 }
 0x17d   : > { %1917 = vmatmul.mubr.f32.gmra.mrb[32].mxu1 %v2968_v46 }
 0x17e   : > { %1919 = vmatprep.mubr.msk.f32.mxu1 %vm2484_vm0, %v2485_v1 }
 0x17f   : > { %1988 = vmatmul.mubr.f32.gmra.mrb[38].mxu0 %v778_v49 }
 0x180   : > { %1990 = vmatprep.mubr.msk.f32.mxu0 %vm2484_vm0, %v2485_v1 }
 0x181   : > { %1920 = vmatmul.mubr.f32.gmra.mrb[34].mxu1 %v2978_v48 }
 0x182   : > { %2025 = vmatprep.mubr.msk.f32.mxu1 %vm2484_vm0, %v2485_v1 }
 0x183   : > { %1991 = vmatmul.mubr.f32.gmra.mrb[40].mxu0 %v779_v51 }
 0x184   : > { %2080 = vmatprep.mubr.msk.f32.mxu0 %vm2484_vm0, %v2485_v1 }
 0x224   : > { %v703_v3 = vpop.f32.mrb[10].mxu1 }
 0x225   : > { %v910_v4 = vmul.f32 %v703_v3, %v703_v3  ;;  %v1885_v5 = vpop.f32.mrb[11].mxu1  ;;  %v949_v47 = vsub.f32 %v2838_v54, %v703_v3  ;;  %v3045_v54 = vld [vmem:[#allocation5] ss:$0 sm:$0xff] }
 0x226   : > { %v846_v6 = vpop.f32.mrb[16].mxu0 }
 0x227   : > { %v923_v7 = vsub.f32 %v846_v6, %v910_v4  ;;  %v1956_v8 = vpop.f32.mrb[17].mxu0 }
 0x228   : > { %v708_v9 = vpop.f32.mrb[12].mxu1 }
 0x229   : > { %v936_v11 = vmax.f32 %v923_v7, 0.0  ;;  %v911_v12 = vmul.f32 %v708_v9, %v708_v9  ;;  %v1888_v13 = vpop.f32.mrb[13].mxu1  ;;  %v950_v61 = vsub.f32 %v2854_v63, %v708_v9 }
 0x22a   : > { %v851_v14 = vpop.f32.mrb[18].mxu0 }
 0x22b   : > { %v962_v15 = vadd.f32 1e-05, %v936_v11  ;;  %v924_v16 = vsub.f32 %v851_v14, %v911_v12  ;;  %v1959_v17 = vpop.f32.mrb[19].mxu0 }
 0x22c   : > { %v3023_v18 = vpop.f32.mrb[14].mxu1 }
 0x22d   : > { %2296 = vrsqrt.f32 %v962_v15  ;;  %v937_v20 = vmax.f32 %v924_v16, 0.0  ;;  %v912_v21 = vmul.f32 %v3023_v18, %v3023_v18  ;;  %v1891_v22 = vpop.f32.mrb[15].mxu1  ;;  %v951_v63 = vsub.f32 %v2873_v10, %v3023_v18 }
 0x22e   : > { %v856_v23 = vpop.f32.mrb[20].mxu0 }
 0x22f   : > { %v963_v24 = vadd.f32 1e-05, %v937_v20  ;;  %v925_v26 = vsub.f32 %v856_v23, %v912_v21  ;;  %v1962_v27 = vpop.f32.mrb[21].mxu0 }
 0x230   : > { %v3027_v28 = vpop.f32.mrb[16].mxu1 }
 0x231   : > { %2298 = vrsqrt.f32 %v963_v24  ;;  %v938_v29 = vmax.f32 %v925_v26, 0.0  ;;  %v913_v31 = vmul.f32 %v3027_v28, %v3027_v28  ;;  %v1894_v32 = vpop.f32.mrb[17].mxu1  ;;  %v952_v18 = vsub.f32 %v2890_v19, %v3027_v28 }
 0x232   : > { %v861_v33 = vpop.f32.mrb[22].mxu0 }
 0x233   : > { %v964_v35 = vadd.f32 1e-05, %v938_v29  ;;  %v926_v36 = vsub.f32 %v861_v33, %v913_v31  ;;  %v1965_v37 = vpop.f32.mrb[23].mxu0 }
 0x234   : > { %v3031_v39 = vpop.f32.mrb[18].mxu1 }
 0x235   : > { %2300 = vrsqrt.f32 %v964_v35  ;;  %v939_v41 = vmax.f32 %v926_v36, 0.0  ;;  %v914_v43 = vmul.f32 %v3031_v39, %v3031_v39  ;;  %v1897_v45 = vpop.f32.mrb[19].mxu1  ;;  %v953_v28 = vsub.f32 %v2901_v25, %v3031_v39 }
 0x236   : > { %v866_v49 = vpop.f32.mrb[24].mxu0 }
 0x237   : > { %v2297_v51 = vpop.eup %2296  ;;  %v965_v50 = vadd.f32 1e-05, %v939_v41  ;;  %v927_v52 = vsub.f32 %v866_v49, %v914_v43  ;;  %v1968_v53 = vpop.f32.mrb[25].mxu0 }
 0x238   : > { %v988_v56 = vmul.f32 %v2297_v51, %v949_v47  ;;  %v3041_v57 = vpop.f32.mrb[20].mxu1 }
 0x239   : > { %2302 = vrsqrt.f32 %v965_v50  ;;  %v940_v58 = vmax.f32 %v927_v52, 0.0  ;;  %v915_v59 = vmul.f32 %v3041_v57, %v3041_v57  ;;  %v1900_v60 = vpop.f32.mrb[21].mxu1  ;;  %v954_v39 = vsub.f32 %v2912_v30, %v3041_v57 }
 0x23a   : > { %v871_v62 = vpop.f32.mrb[26].mxu0  ;;  %v1008_v2 = vmul.f32 %v3039_v55, %v988_v56 }
 0x23b   : > { %v2299_v3 = vpop.eup %2298  ;;  %v966_v4 = vadd.f32 1e-05, %v940_v58  ;;  %v928_v5 = vsub.f32 %v871_v62, %v915_v59  ;;  %v1971_v6 = vpop.f32.mrb[27].mxu0 }
 0x23c   : > { %v3049_v7 = vpop.f32.mrb[22].mxu1  ;;  %v1028_v8 = vadd.f32 %v3045_v54, %v1008_v2  ;;  %v989_v11 = vmul.f32 %v2299_v3, %v950_v61 }
 0x23d   : > { %2304 = vrsqrt.f32 %v966_v4  ;;  %v941_v12 = vmax.f32 %v928_v5, 0.0  ;;  %v916_v13 = vmul.f32 %v3049_v7, %v3049_v7  ;;  %v1903_v14 = vpop.f32.mrb[23].mxu1  ;;  %v955_v57 = vsub.f32 %v2922_v34, %v3049_v7 }
 0x23e   : > { %v876_v9 = vpop.f32.mrb[28].mxu0  ;;  %v1041_v15 = vmax.f32 %v1028_v8, 0.0  ;;  %v1009_v16 = vmul.f32 %v3039_v55, %v989_v11 }
 0x23f   : > { %v2301_v17 = vpop.eup %2300  ;;  %v967_v20 = vadd.f32 1e-05, %v941_v12  ;;  %v929_v21 = vsub.f32 %v876_v9, %v916_v13  ;;  %v1974_v22 = vpop.f32.mrb[29].mxu0 }
 0x240   : > { %v3057_v23 = vpop.f32.mrb[24].mxu1  ;;  %2026 = vmatmul.mubr.f32.vlgmr.msra.gmra.mrb[36].mxu1 %v1041_v15  ;;  %v1029_v24 = vadd.f32 %v3045_v54, %v1009_v16  ;;  %v990_v26 = vmul.f32 %v2301_v17, %v951_v63 }
 0x241   : > { %2306 = vrsqrt.f32 %v967_v20  ;;  %v942_v27 = vmax.f32 %v929_v21, 0.0  ;;  %v917_v29 = vmul.f32 %v3057_v23, %v3057_v23  ;;  %v1906_v10 = vpop.f32.mrb[25].mxu1  ;;  %2028 = vmatprep.mubr.msk.f32.mxu1 %vm2484_vm0, %v2485_v1  ;;  %v956_v7 = vsub.f32 %v2932_v38, %v3057_v23 }
 0x242   : > { %v881_v31 = vpop.f32.mrb[30].mxu0  ;;  %v1042_v32 = vmax.f32 %v1029_v24, 0.0  ;;  %v1010_v33 = vmul.f32 %v3039_v55, %v990_v26 }
 0x243   : > { %v2303_v35 = vpop.eup %2302  ;;  %v968_v36 = vadd.f32 1e-05, %v942_v27  ;;  %v930_v37 = vsub.f32 %v881_v31, %v917_v29  ;;  %v1977_v41 = vpop.f32.mrb[31].mxu0 }
 0x244   : > { %v3067_v43 = vpop.f32.mrb[26].mxu1  ;;  %2029 = vmatmul.mubr.f32.gmra.mrb[38].mxu1 %v1042_v32  ;;  %v1030_v45 = vadd.f32 %v3045_v54, %v1010_v33  ;;  %v991_v47 = vmul.f32 %v2303_v35, %v952_v18 }
 0x245   : > { %2308 = vrsqrt.f32 %v968_v36  ;;  %v943_v49 = vmax.f32 %v930_v37, 0.0  ;;  %v918_v51 = vmul.f32 %v3067_v43, %v3067_v43  ;;  %v1909_v19 = vpop.f32.mrb[27].mxu1  ;;  %2031 = vmatprep.mubr.msk.f32.mxu1 %vm2484_vm0, %v2485_v1  ;;  %v957_v38 = vsub.f32 %v2936_v40, %v3067_v43 }
 0x246   : > { %v886_v50 = vpop.f32.mrb[32].mxu0  ;;  %v1043_v52 = vmax.f32 %v1030_v45, 0.0  ;;  %v1011_v53 = vmul.f32 %v3039_v55, %v991_v47 }
 0x247   : > { %v2305_v56 = vpop.eup %2304  ;;  %v969_v58 = vadd.f32 1e-05, %v943_v49  ;;  %v931_v59 = vsub.f32 %v886_v50, %v918_v51  ;;  %v1980_v60 = vpop.f32.mrb[33].mxu0 }
 0x248   : > { %v3077_v61 = vpop.f32.mrb[28].mxu1  ;;  %2032 = vmatmul.mubr.f32.gmra.mrb[40].mxu1 %v1043_v52  ;;  %v1031_v62 = vadd.f32 %v3045_v54, %v1011_v53  ;;  %v992_v2 = vmul.f32 %v2305_v56, %v953_v28 }
 0x249   : > { %2310 = vrsqrt.f32 %v969_v58  ;;  %v944_v3 = vmax.f32 %v931_v59, 0.0  ;;  %v919_v4 = vmul.f32 %v3077_v61, %v3077_v61  ;;  %v1912_v25 = vpop.f32.mrb[29].mxu1  ;;  %2034 = vmatprep.mubr.msk.f32.mxu1 %vm2484_vm0, %v2485_v1  ;;  %v958_v40 = vsub.f32 %v2947_v42, %v3077_v61 }
 0x24a   : > { %v891_v5 = vpop.f32.mrb[34].mxu0  ;;  %v1044_v6 = vmax.f32 %v1031_v62, 0.0  ;;  %v1012_v8 = vmul.f32 %v3039_v55, %v992_v2 }
 0x24b   : > { %v2307_v11 = vpop.eup %2306  ;;  %v970_v12 = vadd.f32 1e-05, %v944_v3  ;;  %v932_v13 = vsub.f32 %v891_v5, %v919_v4  ;;  %v1983_v14 = vpop.f32.mrb[35].mxu0 }
 0x24c   : > { %v3087_v63 = vpop.f32.mrb[30].mxu1  ;;  %2035 = vmatmul.mubr.f32.gmra.mrb[42].mxu1 %v1044_v6  ;;  %v1032_v9 = vadd.f32 %v3045_v54, %v1012_v8  ;;  %v993_v15 = vmul.f32 %v2307_v11, %v954_v39 }
 0x24d   : > { %2312 = vrsqrt.f32 %v970_v12  ;;  %v945_v16 = vmax.f32 %v932_v13, 0.0  ;;  %v920_v17 = vmul.f32 %v3087_v63, %v3087_v63  ;;  %v1915_v30 = vpop.f32.mrb[31].mxu1  ;;  %2037 = vmatprep.mubr.msk.f32.mxu1 %vm2484_vm0, %v2485_v1  ;;  %v959_v12 = vsub.f32 %v2958_v44, %v3087_v63 }
 0x24e   : > { %v896_v20 = vpop.f32.mrb[36].mxu0  ;;  %v1045_v21 = vmax.f32 %v1032_v9, 0.0  ;;  %v1013_v22 = vmul.f32 %v3039_v55, %v993_v15 }
 0x24f   : > { %v2309_v24 = vpop.eup %2308  ;;  %v971_v26 = vadd.f32 1e-05, %v945_v16  ;;  %v933_v27 = vsub.f32 %v896_v20, %v920_v17  ;;  %v1986_v29 = vpop.f32.mrb[37].mxu0 }
 0x250   : > { %v3097_v10 = vpop.f32.mrb[32].mxu1  ;;  %2038 = vmatmul.mubr.f32.gmra.mrb[44].mxu1 %v1045_v21  ;;  %v1033_v18 = vadd.f32 %v3045_v54, %v1013_v22  ;;  %v994_v31 = vmul.f32 %v2309_v24, %v955_v57 }
 0x251   : > { %2314 = vrsqrt.f32 %v971_v26  ;;  %v946_v32 = vmax.f32 %v933_v27, 0.0  ;;  %v921_v33 = vmul.f32 %v3097_v10, %v3097_v10  ;;  %v1918_v34 = vpop.f32.mrb[33].mxu1  ;;  %2040 = vmatprep.mubr.msk.f32.mxu1 %vm2484_vm0, %v2485_v1  ;;  %v960_v15 = vsub.f32 %v2968_v46, %v3097_v10  ;;  %v1234_v10 = vld [vmem:[%s3379_s8] sm:$0xff] }
 0x252   : > { %v901_v35 = vpop.f32.mrb[38].mxu0  ;;  %v1046_v36 = vmax.f32 %v1033_v18, 0.0  ;;  %v1014_v37 = vmul.f32 %v3039_v55, %v994_v31  ;;  %v1235_v18 = vld [vmem:[%s3379_s8 + $0x8] sm:$0xff] }
 0x253   : > { %v2311_v41 = vpop.eup %2310  ;;  %v972_v45 = vadd.f32 1e-05, %v946_v32  ;;  %v934_v47 = vsub.f32 %v901_v35, %v921_v33  ;;  %v1989_v49 = vpop.f32.mrb[39].mxu0  ;;  %v2201_v31 = vpack.c.bf16 %v1235_v18, %v1234_v10  ;;  %v1238_v33 = vld [vmem:[%s3379_s8 + $0x20] sm:$0xff]  ;;  %v1239_v34 = vld [vmem:[%s3379_s8 + $0x28] sm:$0xff]  ;;  %v1240_v35 = vld [vmem:[%s3379_s8 + $0x30] sm:$0xff] }
 0x254   : > { %v763_v51 = vpop.f32.mrb[34].mxu1  ;;  %2041 = vmatmul.mubr.f32.gmra.mrb[46].mxu1 %v1046_v36  ;;  %v1034_v19 = vadd.f32 %v3045_v54, %v1014_v37  ;;  %v995_v28 = vmul.f32 %v2311_v41, %v956_v7  ;;  %v2207_v7 = vpack.c.bf16 %v1239_v34, %v1238_v33  ;;  %v1241_v36 = vld [vmem:[%s3379_s8 + $0x38] sm:$0xff] }
 0x255   : > { %2316 = vrsqrt.f32 %v972_v45  ;;  %v947_v50 = vmax.f32 %v934_v47, 0.0  ;;  %v922_v52 = vmul.f32 %v763_v51, %v763_v51  ;;  %v1921_v53 = vpop.f32.mrb[35].mxu1  ;;  %2043 = vmatprep.mubr.msk.f32.mxu1 %vm2484_vm0, %v2485_v1  ;;  %v961_v57 = vsub.f32 %v2978_v48, %v763_v51  ;;  %2202 = vmatpush3.bf16.msra.mxu0 %v2201_v31  ;;  %v3173_v41 = vld [vmem:[#allocation7] ss:$0 sm:$0xff] }
 0x256   : > { %v906_v23 = vpop.f32.mrb[40].mxu0  ;;  %v1047_v56 = vmax.f32 %v1034_v19, 0.0  ;;  %v1015_v58 = vmul.f32 %v3039_v55, %v995_v28  ;;  %2203 = vmatprep.subr.bf16.mxu0 %v2483_v0  ;;  %v2210_v37 = vpack.c.bf16 %v1241_v36, %v1240_v35 }
 0x257   : > { %v2313_v59 = vpop.eup %2312  ;;  %v973_v60 = vadd.f32 1e-05, %v947_v50  ;;  %v935_v62 = vsub.f32 %v906_v23, %v922_v52  ;;  %v1992_v2 = vpop.f32.mrb[41].mxu0 }
 0x258   : > { %2044 = vmatmul.mubr.f32.gmra.mrb[48].mxu1 %v1047_v56  ;;  %v1035_v3 = vadd.f32 %v3045_v54, %v1015_v58  ;;  %v996_v4 = vmul.f32 %v2313_v59, %v957_v38 }
 0x259   : > { %2318 = vrsqrt.f32 %v973_v60  ;;  %v948_v25 = vmax.f32 %v935_v62, 0.0  ;;  %2046 = vmatprep.mubr.msk.f32.mxu1 %vm2484_vm0, %v2485_v1 }
 0x25a   : > { %v1048_v43 = vmax.f32 %v1035_v3, 0.0  ;;  %v1016_v39 = vmul.f32 %v3039_v55, %v996_v4 }
 0x25b   : > { %v2315_v5 = vpop.eup %2314  ;;  %v974_v6 = vadd.f32 1e-05, %v948_v25 }
 0x25c   : > { %2047 = vmatmul.mubr.f32.gmra.mrb[50].mxu1 %v1048_v43  ;;  %v1036_v8 = vadd.f32 %v3045_v54, %v1016_v39  ;;  %v997_v11 = vmul.f32 %v2315_v5, %v958_v40 }
 0x25d   : > { %2320 = vrsqrt.f32 %v974_v6  ;;  %2049 = vmatprep.mubr.msk.f32.mxu1 %vm2484_vm0, %v2485_v1 }
 0x25e   : > { %v1049_v13 = vmax.f32 %v1036_v8, 0.0  ;;  %v1017_v14 = vmul.f32 %v3039_v55, %v997_v11 }
 0x25f   : > { %v2317_v42 = vpop.eup %2316 }
 0x260   : > { %2050 = vmatmul.mubr.f32.gmra.mrb[52].mxu1 %v1049_v13  ;;  %v1037_v61 = vadd.f32 %v3045_v54, %v1017_v14  ;;  %v998_v9 = vmul.f32 %v2317_v42, %v959_v12 }
 0x261   : > { %2052 = vmatprep.mubr.msk.f32.mxu1 %vm2484_vm0, %v2485_v1 }
 0x262   : > { %v1050_v16 = vmax.f32 %v1037_v61, 0.0  ;;  %v1018_v17 = vmul.f32 %v3039_v55, %v998_v9 }
 0x263   : > { %v2319_v30 = vpop.eup %2318 }
 0x264   : > { %2053 = vmatmul.mubr.f32.gmra.mrb[54].mxu1 %v1050_v16  ;;  %v1038_v44 = vadd.f32 %v3045_v54, %v1018_v17  ;;  %v999_v63 = vmul.f32 %v2319_v30, %v960_v15 }
 0x265   : > { %2055 = vmatprep.mubr.msk.f32.mxu1 %vm2484_vm0, %v2485_v1 }
 0x266   : > { %v1051_v20 = vmax.f32 %v1038_v44, 0.0  ;;  %v1019_v21 = vmul.f32 %v3039_v55, %v999_v63 }
 0x267   : > { %v2321_v22 = vpop.eup %2320 }
 0x268   : > { %2056 = vmatmul.mubr.f32.gmra.mrb[56].mxu1 %v1051_v20  ;;  %v1039_v46 = vadd.f32 %v3045_v54, %v1019_v21  ;;  %v1000_v24 = vmul.f32 %v2321_v22, %v961_v57 }
 0x269   : > { %2058 = vmatprep.mubr.msk.f32.mxu1 %vm2484_vm0, %v2485_v1 }
 0x26a   : > { %v1052_v26 = vmax.f32 %v1039_v46, 0.0  ;;  %v1020_v27 = vmul.f32 %v3039_v55, %v1000_v24  ;;  %v1236_v55 = vld [vmem:[%s3379_s8 + $0x10] sm:$0xff] }
 0x26c   : > { %2059 = vmatmul.mubr.f32.gmra.mrb[58].mxu1 %v1052_v26  ;;  %v1040_v29 = vadd.f32 %v3045_v54, %v1020_v27  ;;  %v1237_v54 = vld [vmem:[%s3379_s8 + $0x18] sm:$0xff] }
 0x26d   : > { %2061 = vmatprep.mubr.msk.f32.mxu1 %vm2484_vm0, %v2485_v1  ;;  %v2204_v32 = vpack.c.bf16 %v1237_v54, %v1236_v55 }
 0x26e   : > { %v1053_v48 = vmax.f32 %v1040_v29, 0.0 }
 0x26f   : > { %2205 = vmatpush3.bf16.msra.mxu0 %v2204_v32 }
 0x270   : > { %2062 = vmatmul.mubr.f32.gmra.mrb[60].mxu1 %v1053_v48  ;;  %2206 = vmatprep.subr.bf16.mxu0 %v2483_v0 }
 0x273   : > { %2208 = vmatpush3.bf16.msra.mxu0 %v2207_v7 }
 0x274   : > { %2209 = vmatprep.subr.bf16.mxu0 %v2483_v0 }
 0x277   : > { %2211 = vmatpush3.bf16.msra.mxu0 %v2210_v37 }
 0x313   : > { %v1143_v45 = vpop.f32.mrb[36].mxu1 }
 0x314   : > { %v1144_v47 = vadd.f32 %v3173_v41, %v1143_v45  ;;  %v2027_v49 = vpop.f32.mrb[37].mxu1 }
 0x315   : > { %v1651_v49 = vld [vmem:[%s3380_s9] ss:$0 sm:$0xff] }
 0x316   : > { %1208 = vst.msk [vmem:[%s3176_s28] sm:$0xff] %vm1207_vm2, %v1144_v47  ;;  %v1221_v51 = vmax.f32 %v1144_v47, 0.0 }
 0x317   : > { %v1148_v19 = vpop.f32.mrb[38].mxu1 }
 0x318   : > { %v1149_v0 = vadd.f32 %v3173_v41, %v1148_v19  ;;  %1262 = vrot.lane.b32.xlu0 %v1221_v51, %s2486_s15  ;;  %v2030_v28 = vpop.f32.mrb[39].mxu1 }
 0x31a   : > { %1209 = vst.msk [vmem:[%s3176_s28 + $0x8] sm:$0xff] %vm1207_vm2, %v1149_v0  ;;  %v1222_v50 = vmax.f32 %v1149_v0, 0.0 }
 0x31b   : > { %v1153_v52 = vpop.f32.mrb[40].mxu1 }
 0x31c   : > { %v1154_v53 = vadd.f32 %v3173_v41, %v1153_v52  ;;  %1264 = vrot.lane.b32.xlu0 %v1222_v50, %s2486_s15  ;;  %v2033_v38 = vpop.f32.mrb[41].mxu1 }
 0x31e   : > { %1210 = vst.msk [vmem:[%s3176_s28 + $0x10] sm:$0xff] %vm1207_vm2, %v1154_v53  ;;  %v1223_v23 = vmax.f32 %v1154_v53, 0.0 }
 0x31f   : > { %v1158_v56 = vpop.f32.mrb[42].mxu1 }
 0x320   : > { %v1159_v58 = vadd.f32 %v3173_v41, %v1158_v56  ;;  %1266 = vrot.lane.b32.xlu1 %v1223_v23, %s2486_s15  ;;  %v2036_v59 = vpop.f32.mrb[43].mxu1 }
 0x322   : > { %1211 = vst.msk [vmem:[%s3176_s28 + $0x18] sm:$0xff] %vm1207_vm2, %v1159_v58  ;;  %v1224_v60 = vmax.f32 %v1159_v58, 0.0 }
 0x323   : > { %v1163_v62 = vpop.f32.mrb[44].mxu1 }
 0x324   : > { %v1164_v2 = vadd.f32 %v3173_v41, %v1163_v62  ;;  %1268 = vrot.lane.b32.xlu1 %v1224_v60, %s2486_s15  ;;  %v2039_v3 = vpop.f32.mrb[45].mxu1 }
 0x326   : > { %1212 = vst.msk [vmem:[%s3176_s28 + $0x20] sm:$0xff] %vm1207_vm2, %v1164_v2  ;;  %v1225_v4 = vmax.f32 %v1164_v2, 0.0 }
 0x327   : > { %v1168_v25 = vpop.f32.mrb[46].mxu1 }
 0x328   : > { %v1169_v40 = vadd.f32 %v3173_v41, %v1168_v25  ;;  %1270 = vrot.lane.b32.xlu0 %v1225_v4, %s2486_s15  ;;  %v2042_v43 = vpop.f32.mrb[47].mxu1 }
 0x32a   : > { %1213 = vst.msk [vmem:[%s3176_s28 + $0x28] sm:$0xff] %vm1207_vm2, %v1169_v40  ;;  %v1226_v39 = vmax.f32 %v1169_v40, 0.0 }
 0x32b   : > { %v1173_v5 = vpop.f32.mrb[48].mxu1 }
 0x32c   : > { %v1174_v6 = vadd.f32 %v3173_v41, %v1173_v5  ;;  %1272 = vrot.lane.b32.xlu1 %v1226_v39, %s2486_s15  ;;  %v2045_v8 = vpop.f32.mrb[49].mxu1 }
 0x32e   : > { %1214 = vst.msk [vmem:[%s3176_s28 + $0x30] sm:$0xff] %vm1207_vm2, %v1174_v6  ;;  %v1227_v11 = vmax.f32 %v1174_v6, 0.0 }
 0x32f   : > { %v1178_v12 = vpop.f32.mrb[50].mxu1 }
 0x330   : > { %v1179_v13 = vadd.f32 %v3173_v41, %v1178_v12  ;;  %1274 = vrot.lane.b32.xlu0 %v1227_v11, %s2486_s15  ;;  %v2048_v14 = vpop.f32.mrb[51].mxu1 }
 0x332   : > { %1215 = vst.msk [vmem:[%s3176_s28 + $0x38] sm:$0xff] %vm1207_vm2, %v1179_v13  ;;  %v1228_v42 = vmax.f32 %v1179_v13, 0.0 }
 0x333   : > { %v1183_v61 = vpop.f32.mrb[52].mxu1 }
 0x334   : > { %v1184_v9 = vadd.f32 %v3173_v41, %v1183_v61  ;;  %1276 = vrot.lane.b32.xlu1 %v1228_v42, %s2486_s15  ;;  %v2051_v15 = vpop.f32.mrb[53].mxu1 }
 0x336   : > { %1216 = vst.msk [vmem:[%s3176_s28 + $0x40] sm:$0xff] %vm1207_vm2, %v1184_v9  ;;  %v1229_v16 = vmax.f32 %v1184_v9, 0.0 }
 0x337   : > { %v1188_v17 = vpop.f32.mrb[54].mxu1 }
 0x338   : > { %v1189_v30 = vadd.f32 %v3173_v41, %v1188_v17  ;;  %1278 = vrot.lane.b32.xlu0 %v1229_v16, %s2486_s15  ;;  %v2054_v44 = vpop.f32.mrb[55].mxu1 }
 0x33a   : > { %1217 = vst.msk [vmem:[%s3176_s28 + $0x48] sm:$0xff] %vm1207_vm2, %v1189_v30  ;;  %v1230_v63 = vmax.f32 %v1189_v30, 0.0 }
 0x33b   : > { %v1193_v57 = vpop.f32.mrb[56].mxu1 }
 0x33c   : > { %v1194_v20 = vadd.f32 %v3173_v41, %v1193_v57  ;;  %1280 = vrot.lane.b32.xlu1 %v1230_v63, %s2486_s15  ;;  %v2057_v21 = vpop.f32.mrb[57].mxu1 }
 0x33e   : > { %1218 = vst.msk [vmem:[%s3176_s28 + $0x50] sm:$0xff] %vm1207_vm2, %v1194_v20  ;;  %v1231_v22 = vmax.f32 %v1194_v20, 0.0 }
 0x33f   : > { %v1198_v46 = vpop.f32.mrb[58].mxu1 }
 0x340   : > { %v1199_v24 = vadd.f32 %v3173_v41, %v1198_v46  ;;  %1282 = vrot.lane.b32.xlu0 %v1231_v22, %s2486_s15  ;;  %v2060_v26 = vpop.f32.mrb[59].mxu1 }
 0x342   : > { %1219 = vst.msk [vmem:[%s3176_s28 + $0x58] sm:$0xff] %vm1207_vm2, %v1199_v24  ;;  %v1232_v27 = vmax.f32 %v1199_v24, 0.0 }
 0x343   : > { %v1203_v29 = vpop.f32.mrb[60].mxu1 }
 0x344   : > { %v1204_v48 = vadd.f32 %v3173_v41, %v1203_v29  ;;  %1284 = vrot.lane.b32.xlu1 %v1232_v27, %s2486_s15  ;;  %v2063_v10 = vpop.f32.mrb[61].mxu1 }
 0x346   : > { %1220 = vst.msk [vmem:[%s3176_s28 + $0x60] sm:$0xff] %vm1207_vm2, %v1204_v48  ;;  %v1233_v18 = vmax.f32 %v1204_v48, 0.0 }
 0x348   : > { %1286 = vrot.lane.b32.xlu0 %v1233_v18, %s2486_s15 }
 0x38a   : > { %v1263_v55 = vpop.permute.xlu0 %1262 }
 0x38b   : > { %2081 = vmatmul.mubr.msk.f32.vlgmr.msra.gmra.mrb[42].mxu0 %vm1207_vm2, %v1263_v55 }
 0x38c   : > { %2083 = vmatprep.mubr.msk.f32.mxu0 %vm2484_vm0, %v2485_v1 }
 0x38e   : > { %v1265_v31 = vpop.permute.xlu0 %1264 }
 0x38f   : > { %2084 = vmatmul.mubr.msk.f32.gmra.mrb[44].mxu0 %vm1207_vm2, %v1265_v31 }
 0x390   : > { %2086 = vmatprep.mubr.msk.f32.mxu0 %vm2484_vm0, %v2485_v1 }
 0x392   : > { %v1267_v54 = vpop.permute.xlu1 %1266 }
 0x393   : > { %2087 = vmatmul.mubr.msk.f32.gmra.mrb[46].mxu0 %vm1207_vm2, %v1267_v54 }
 0x394   : > { %2089 = vmatprep.mubr.msk.f32.mxu0 %vm2484_vm0, %v2485_v1 }
 0x396   : > { %v1269_v32 = vpop.permute.xlu1 %1268 }
 0x397   : > { %2090 = vmatmul.mubr.msk.f32.gmra.mrb[48].mxu0 %vm1207_vm2, %v1269_v32 }
 0x398   : > { %2092 = vmatprep.mubr.msk.f32.mxu0 %vm2484_vm0, %v2485_v1 }
 0x39a   : > { %v1271_v33 = vpop.permute.xlu0 %1270 }
 0x39b   : > { %2093 = vmatmul.mubr.msk.f32.gmra.mrb[50].mxu0 %vm1207_vm2, %v1271_v33 }
 0x39c   : > { %2095 = vmatprep.mubr.msk.f32.mxu0 %vm2484_vm0, %v2485_v1 }
 0x39e   : > { %v1273_v34 = vpop.permute.xlu1 %1272 }
 0x39f   : > { %2096 = vmatmul.mubr.msk.f32.gmra.mrb[52].mxu0 %vm1207_vm2, %v1273_v34 }
 0x3a0   : > { %2098 = vmatprep.mubr.msk.f32.mxu0 %vm2484_vm0, %v2485_v1 }
 0x3a2   : > { %v1275_v7 = vpop.permute.xlu0 %1274 }
 0x3a3   : > { %2099 = vmatmul.mubr.msk.f32.gmra.mrb[54].mxu0 %vm1207_vm2, %v1275_v7 }
 0x3a4   : > { %2101 = vmatprep.mubr.msk.f32.mxu0 %vm2484_vm0, %v2485_v1 }
 0x3a6   : > { %v1277_v35 = vpop.permute.xlu1 %1276 }
 0x3a7   : > { %2102 = vmatmul.mubr.msk.f32.gmra.mrb[56].mxu0 %vm1207_vm2, %v1277_v35 }
 0x3a8   : > { %2104 = vmatprep.mubr.msk.f32.mxu0 %vm2484_vm0, %v2485_v1 }
 0x3aa   : > { %v1279_v36 = vpop.permute.xlu0 %1278 }
 0x3ab   : > { %2105 = vmatmul.mubr.msk.f32.gmra.mrb[58].mxu0 %vm1207_vm2, %v1279_v36 }
 0x3ac   : > { %2107 = vmatprep.mubr.msk.f32.mxu0 %vm2484_vm0, %v2485_v1 }
 0x3ae   : > { %v1281_v37 = vpop.permute.xlu1 %1280 }
 0x3af   : > { %2108 = vmatmul.mubr.msk.f32.gmra.mrb[60].mxu0 %vm1207_vm2, %v1281_v37 }
 0x3b0   : > { %2110 = vmatprep.mubr.msk.f32.mxu0 %vm2484_vm0, %v2485_v1 }
 0x3b2   : > { %v1283_v41 = vpop.permute.xlu0 %1282 }
 0x3b3   : > { %2111 = vmatmul.mubr.msk.f32.gmra.mrb[62].mxu0 %vm1207_vm2, %v1283_v41 }
 0x3b4   : > { %2113 = vmatprep.mubr.msk.f32.mxu0 %vm2484_vm0, %v2485_v1 }
 0x3b6   : > { %v1285_v45 = vpop.permute.xlu1 %1284 }
 0x3b7   : > { %2114 = vmatmul.mubr.msk.f32.gmra.mrb[64].mxu0 %vm1207_vm2, %v1285_v45 }
 0x3b8   : > { %2116 = vmatprep.mubr.msk.f32.mxu0 %vm2484_vm0, %v2485_v1 }
 0x3ba   : > { %v1287_v47 = vpop.permute.xlu0 %1286 }
 0x3bb   : > { %2117 = vmatmul.mubr.msk.f32.gmra.mrb[66].mxu0 %vm1207_vm2, %v1287_v47 }
 0x45e   : > { %v1380_v51 = vpop.f32.mrb[42].mxu0 }
 0x45f   : > { %v1381_v19 = vadd.f32 %v1651_v49, %v1380_v51  ;;  %v2082_v0 = vpop.f32.mrb[43].mxu0 }
 0x461   : > { %1457 = vrot.lane.b32.xlu1 %v1381_v19, %s2486_s15 }
 0x462   : > { %v1385_v28 = vpop.f32.mrb[44].mxu0 }
 0x463   : > { %v1386_v50 = vadd.f32 %v1651_v49, %v1385_v28  ;;  %v2085_v52 = vpop.f32.mrb[45].mxu0 }
 0x465   : > { %1459 = vrot.lane.b32.xlu0 %v1386_v50, %s2486_s15 }
 0x466   : > { %v1390_v53 = vpop.f32.mrb[46].mxu0 }
 0x467   : > { %v1391_v38 = vadd.f32 %v1651_v49, %v1390_v53  ;;  %v2088_v1 = vpop.f32.mrb[47].mxu0 }
 0x469   : > { %1461 = vrot.lane.b32.xlu1 %v1391_v38, %s2486_s15 }
 0x46a   : > { %v1395_v23 = vpop.f32.mrb[48].mxu0 }
 0x46b   : > { %v1396_v56 = vadd.f32 %v1651_v49, %v1395_v23  ;;  %v2091_v58 = vpop.f32.mrb[49].mxu0 }
 0x46d   : > { %1463 = vrot.lane.b32.xlu0 %v1396_v56, %s2486_s15 }
 0x46e   : > { %v1400_v59 = vpop.f32.mrb[50].mxu0 }
 0x46f   : > { %v1401_v60 = vadd.f32 %v1651_v49, %v1400_v59  ;;  %v2094_v62 = vpop.f32.mrb[51].mxu0 }
 0x471   : > { %1465 = vrot.lane.b32.xlu1 %v1401_v60, %s2486_s15 }
 0x472   : > { %v1405_v2 = vpop.f32.mrb[52].mxu0 }
 0x473   : > { %v1406_v3 = vadd.f32 %v1651_v49, %v1405_v2  ;;  %v2097_v4 = vpop.f32.mrb[53].mxu0 }
 0x475   : > { %1467 = vrot.lane.b32.xlu0 %v1406_v3, %s2486_s15 }
 0x476   : > { %v1410_v25 = vpop.f32.mrb[54].mxu0 }
 0x477   : > { %v1411_v40 = vadd.f32 %v1651_v49, %v1410_v25  ;;  %v2100_v43 = vpop.f32.mrb[55].mxu0 }
 0x479   : > { %1469 = vrot.lane.b32.xlu1 %v1411_v40, %s2486_s15 }
 0x47a   : > { %v1415_v39 = vpop.f32.mrb[56].mxu0 }
 0x47b   : > { %v1416_v5 = vadd.f32 %v1651_v49, %v1415_v39  ;;  %v2103_v6 = vpop.f32.mrb[57].mxu0 }
 0x47d   : > { %1471 = vrot.lane.b32.xlu0 %v1416_v5, %s2486_s15 }
 0x47e   : > { %v1420_v8 = vpop.f32.mrb[58].mxu0 }
 0x47f   : > { %v1421_v11 = vadd.f32 %v1651_v49, %v1420_v8  ;;  %v2106_v12 = vpop.f32.mrb[59].mxu0 }
 0x481   : > { %1473 = vrot.lane.b32.xlu1 %v1421_v11, %s2486_s15 }
 0x482   : > { %v1425_v13 = vpop.f32.mrb[60].mxu0 }
 0x483   : > { %v1426_v14 = vadd.f32 %v1651_v49, %v1425_v13  ;;  %v2109_v42 = vpop.f32.mrb[61].mxu0 }
 0x485   : > { %1475 = vrot.lane.b32.xlu0 %v1426_v14, %s2486_s15 }
 0x486   : > { %v1430_v61 = vpop.f32.mrb[62].mxu0 }
 0x487   : > { %v1431_v9 = vadd.f32 %v1651_v49, %v1430_v61  ;;  %v2112_v15 = vpop.f32.mrb[63].mxu0 }
 0x489   : > { %1477 = vrot.lane.b32.xlu1 %v1431_v9, %s2486_s15 }
 0x48a   : > { %v1435_v16 = vpop.f32.mrb[64].mxu0 }
 0x48b   : > { %v1436_v17 = vadd.f32 %v1651_v49, %v1435_v16  ;;  %v2115_v30 = vpop.f32.mrb[65].mxu0 }
 0x48d   : > { %1479 = vrot.lane.b32.xlu0 %v1436_v17, %s2486_s15 }
 0x48e   : > { %v1440_v44 = vpop.f32.mrb[66].mxu0 }
 0x48f   : > { %v1441_v63 = vadd.f32 %v1651_v49, %v1440_v44  ;;  %v2118_v57 = vpop.f32.mrb[67].mxu0 }
 0x491   : > { %1481 = vrot.lane.b32.xlu1 %v1441_v63, %s2486_s15 }
 0x4d3   : > { %v1458_v20 = vpop.permute.xlu1 %1457 }
 0x4d4   : > { %1497 = vst.msk [vmem:[%s3176_s28] sm:$0xff] %vm1496_vm3, %v1458_v20 }
 0x4d7   : > { %v1460_v21 = vpop.permute.xlu0 %1459 }
 0x4d8   : > { %1498 = vst.msk [vmem:[%s3176_s28 + $0x8] sm:$0xff] %vm1496_vm3, %v1460_v21 }
 0x4db   : > { %v1462_v22 = vpop.permute.xlu1 %1461 }
 0x4dc   : > { %1499 = vst.msk [vmem:[%s3176_s28 + $0x10] sm:$0xff] %vm1496_vm3, %v1462_v22 }
 0x4df   : > { %v1464_v46 = vpop.permute.xlu0 %1463 }
 0x4e0   : > { %1500 = vst.msk [vmem:[%s3176_s28 + $0x18] sm:$0xff] %vm1496_vm3, %v1464_v46 }
 0x4e3   : > { %v1466_v24 = vpop.permute.xlu1 %1465 }
 0x4e4   : > { %1501 = vst.msk [vmem:[%s3176_s28 + $0x20] sm:$0xff] %vm1496_vm3, %v1466_v24 }
 0x4e7   : > { %v1468_v26 = vpop.permute.xlu0 %1467 }
 0x4e8   : > { %1502 = vst.msk [vmem:[%s3176_s28 + $0x28] sm:$0xff] %vm1496_vm3, %v1468_v26 }
 0x4eb   : > { %v1470_v27 = vpop.permute.xlu1 %1469 }
 0x4ec   : > { %1503 = vst.msk [vmem:[%s3176_s28 + $0x30] sm:$0xff] %vm1496_vm3, %v1470_v27 }
 0x4ef   : > { %v1472_v29 = vpop.permute.xlu0 %1471 }
 0x4f0   : > { %1504 = vst.msk [vmem:[%s3176_s28 + $0x38] sm:$0xff] %vm1496_vm3, %v1472_v29 }
 0x4f3   : > { %v1474_v48 = vpop.permute.xlu1 %1473 }
 0x4f4   : > { %1505 = vst.msk [vmem:[%s3176_s28 + $0x40] sm:$0xff] %vm1496_vm3, %v1474_v48 }
 0x4f7   : > { %v1476_v10 = vpop.permute.xlu0 %1475 }
 0x4f8   : > { %1506 = vst.msk [vmem:[%s3176_s28 + $0x48] sm:$0xff] %vm1496_vm3, %v1476_v10 }
 0x4fb   : > { %v1478_v18 = vpop.permute.xlu1 %1477 }
 0x4fc   : > { %1507 = vst.msk [vmem:[%s3176_s28 + $0x50] sm:$0xff] %vm1496_vm3, %v1478_v18 }
 0x4fe   : > { %1517 = sbr.rel (!%p3404_p9) target bundleno = 1313 (0x521), region = 76 }
 0x4ff   : > { %v1480_v55 = vpop.permute.xlu0 %1479 }
 0x500   : > { %1508 = vst.msk [vmem:[%s3176_s28 + $0x58] sm:$0xff] %vm1496_vm3, %v1480_v55 }
 0x503   : > { %v1482_v31 = vpop.permute.xlu1 %1481 }
 0x504   : > { %1509 = vst.msk [vmem:[%s3176_s28 + $0x60] sm:$0xff] %vm1496_vm3, %v1482_v31 }
 0x505   : > { %s3413_s26 = smov (!%p1520_p10, %s1519_s26), 13 }
 0x506   : > { %s3315_s22 = sshll.u32 %s3413_s26, 7 }
 0x507   : > { %s1524_s27 = ssub.s32 1664, %s3315_s22 }
 0x508   : > { %1525 = vsyncadd %s3310_s18, %s1524_s27  ;;  %p1666_p2 = scmp.ne.s32.totalorder %s3315_s22, 0  ;;  %s1672_s24 = smul.u32 1664, %s2566_s17 }
 0x509   : > { %s1530_s20 = sshll.u32 %s3176_s28, 4  ;;  %s2487_s25 = smov [#allocation8]   ;;  %s3327_s20 = int_to_ptr.vmem [resolvable:$true] %s1530_s20 }
 0x50a   : > { %s3325_s19 = scalar_lea.hbm %s3381_s10, %s1672_s24  ;;  %s2406_s5 = scalar_lea.vmem %s3327_s20, %s3315_s22 }
 0x50b   : > { %p2407_p3 = scmp.ne.s32.totalorder %s3327_s20, %s2406_s5  ;;  %s2410_s30 = sshll.u32 %s2487_s25, 4  ;;  %s2411_s30 = int_to_ptr.vmem [resolvable:$false] %s2410_s30 }
 0x50c   : > { %s2412_s17 = scalar_lea.vmem %s2411_s30, 3328  ;;  %p2413_p8 = scmp.lt.s32.totalorder %s3327_s20, %s2411_s30 }
 0x50d   : > { %p2408_p4 = pnand %p2407_p3, %p1666_p2  ;;  %p2414_p11 = scmp.lt.s32.totalorder %s2412_s17, %s2406_s5 }
 0x50f   : > { %p2409_p7 = pneg %p2408_p4  ;;  %p2415_p13 = por %p2414_p11, %p2413_p8 }
 0x511   : > { %p2416_p1 = pnand %p2415_p13, %p2409_p7 }
 0x513   : > { %2419 = shalt.err (!%p2416_p1)
}
 0x514   : > { %s2420_s12 = scalar_lea.hbm %s3325_s19, %s3315_s22  ;;  %s2424_s21 = scalar_lea.hbm %s3381_s10, 3200 }
 0x515   : > { %p2421_p0 = scmp.ne.s32.totalorder %s3325_s19, %s2420_s12  ;;  %p2425_p12 = scmp.lt.u32.totalorder %s3325_s19, %s3381_s10 }
 0x516   : > { %p2426_p9 = scmp.lt.u32.totalorder %s2424_s21, %s2420_s12  ;;  %p2428_p3 = scmp.lt.u32.totalorder %s2420_s12, %s3325_s19 }
 0x517   : > { %p2422_p6 = pnand %p2421_p0, %p1666_p2 }
 0x518   : > { %p2427_p10 = por %p2426_p9, %p2425_p12 }
 0x519   : > { %p2423_p5 = pneg %p2422_p6 }
 0x51a   : > { %p2429_p4 = por %p2428_p3, %p2427_p10 }
 0x51c   : > { %p2430_p7 = pnand %p2429_p4, %p2423_p5 }
 0x51e   : > { %2433 = shalt.err (!%p2430_p7)
}
 0x51f   : > { %s2488_s27 = smov 128   ;;  %s2489_s24 = smov 8  }
 0x520   : > { %1536 = dma.vmem_to_hbm [thread:$0]  (%p1666_p2), %s3327_s20, %s3315_s22, %s3325_s19, %s3310_s18, %s2488_s27, %s2488_s27, %s2489_s24  }
 0x521 PF: > { %s3405_s23 = sld [smem:[#allocation15_spill]]  ;;  %p2252_p8 = scmp.ge.s32.totalorder %s2476_s16, 2 }
 0x522   : > { %s1545_s29 = sand.u32 1, %s2464_s13  }
 0x523   : > { %s1546_s5 = scalar_lea.sflag [#allocation4], %s1545_s29 }
 0x527   : > { %p3406_p11 = scmp.ne.s32.totalorder %s3405_s23, 0 }
 0x529   : > { %p2243_p13 = pnand %p2252_p8, %p3406_p11 }
 0x52b   : > { %2459 = dma.done.wait (!%p2243_p13), %s1546_s5, 1664  }
 0x52c   : > { %2461 = vsyncadd (!%p2243_p13), %s1546_s5, 4294965632  ;;  %s3407_s16 = sld [smem:[#allocation13_spill]]  ;;  %s3408_s25 = sld [smem:[#allocation12_spill]] }
 0x52d   : > { %s3409_s15 = sld [smem:[#allocation14_spill]]  ;;  %s3410_s13 = smov %s2468_s14 }
 0x532   : > { %p22_p1 = scmp.ge.s32.totalorder %s3407_s16, 4   ;;  %s3411_s14 = smov %s3408_s25 }
 0x534   :  { %24 = sbr.rel (!%p22_p1) target bundleno = 7 (0x7), region = 108 }
 0x53b   :  { %1551 = vsyncpa [#allocation3], 1 }
 0x53c   :  { %1553 = vsyncpa [#allocation3 + $0x1], 1 }
 0x53d   :  { %1554 = vsyncpa [#allocation6], 1 }
 0x53e   :  { %1555 = vsyncpa [#allocation4], 1 }
 0x53f   :  { %1557 = vsyncpa [#allocation4 + $0x1], 1 }

</bundles_post_ra>
